<compile_context>
chip_gen: v7x
topology: tpu7x:2x2x1
jax: 0.10.0
libtpu: 0.0.40
codegen_flags: <defaults>
</compile_context>

<pallas_src>
import functools

import jax
import jax.numpy as jnp
from jax.experimental import pallas as pl
from jax.experimental.pallas import tpu as pltpu


def _gelu(x):
    # exact (erf) GELU — matches torch.nn.GELU() default
    return 0.5 * x * (1.0 + jax.lax.erf(x * 0.7071067811865476))


def raindrop_edge_enhancer_kernel(
    x_ref,                      # (bt, C, HW)
    coords_ref,                 # (2, HW) int32 : row0 = p % W (col), row1 = p // W (row)
    we1_ref, be1_ref,           # (9, C, C), (C, 1)   3x3, dilation 1
    we2_ref, be2_ref,           # (9, C, C), (C, 1)   3x3, dilation 2
    wh1_ref, bh1_ref,           # (C, C),   (C, 1)    1x1
    wh2_ref, bh2_ref,           # (9, C, C), (C, 1)   3x3, dilation 1
    wfe_ref, wfh_ref, bf_ref,   # (C, C), (C, C), (C, 1)  fusion 1x1, split
    gamma_ref,                  # (1, 1) f32 in SMEM
    o_ref,                      # (bt, C, HW)
    *, H, W,
):
    bt, C, HW = x_ref.shape
    gamma = gamma_ref[0, 0]                               # SMEM scalar

    col = coords_ref[0:1, :]                              # (1, HW) int32
    row = coords_ref[1:2, :]                              # (1, HW) int32

    # ---- boundary masks, hoisted: built once per grid step -----------------
    def axis_keep(idx, d, limit):
        keep = jnp.logical_and(idx + d >= 0, idx + d < limit)
        return jnp.where(keep, 1.0, 0.0).astype(jnp.float32)

    col_keep = {d: axis_keep(col, d, W) for d in (-2, -1, 1, 2)}
    row_keep = {d: axis_keep(row, d, H) for d in (-2, -1, 1, 2)}
    tap_mask = {}
    for dil in (1, 2):
        for dy in (-dil, 0, dil):
            for dx in (-dil, 0, dil):
                if (dy, dx) in tap_mask:
                    continue
                if dy == 0 and dx == 0:
                    m = None
                elif dy == 0:
                    m = col_keep[dx]
                elif dx == 0:
                    m = row_keep[dy]
                else:
                    m = row_keep[dy] * col_keep[dx]
                tap_mask[(dy, dx)] = m

    def window(inp, dy, dx):
        # out[:, p] == inp[:, p + dy*W + dx] when the tap lands inside the
        # image, 0 elsewhere (== 'same' zero padding).  The lane shift rides
        # the XLU; the wrapped lanes are exactly the masked-out positions.
        off = dy * W + dx
        win = inp if off == 0 else pltpu.roll(inp, shift=(-off) % HW, axis=1)
        m = tap_mask[(dy, dx)]
        return win if m is None else win * m

    def conv3x3(inp, w_ref, b_ref, dil):
        # Direct per-tap accumulation (no im2col buffer, no stores).
        acc = None
        tap = 0
        for dy in (-dil, 0, dil):
            for dx in (-dil, 0, dil):
                term = jnp.dot(w_ref[tap], window(inp, dy, dx),
                               preferred_element_type=jnp.float32)
                acc = term if acc is None else acc + term
                tap += 1
        return acc + b_ref[...]

    # ---- images packed per grid step (amortize per-step pipeline overhead) -
    for bi in range(bt):
        x = x_ref[bi].astype(jnp.float32)                 # (C, HW)

        # edge branch: conv3x3(pad=1) -> GELU -> conv3x3(pad=2, dilation=2)
        e = conv3x3(x, we1_ref, be1_ref, 1)
        e = _gelu(e)
        e = conv3x3(e, we2_ref, be2_ref, 2)
        # fold the edge half of the fusion 1x1 now so `e` dies early
        fused = (jnp.dot(wfe_ref[...], e, preferred_element_type=jnp.float32)
                 + bf_ref[...])

        # high-freq branch: conv1x1 -> GELU -> conv3x3(pad=1)
        h = jnp.dot(wh1_ref[...], x, preferred_element_type=jnp.float32) + bh1_ref[...]
        h = _gelu(h)
        h = conv3x3(h, wh2_ref, bh2_ref, 1)
        fused = fused + jnp.dot(wfh_ref[...], h, preferred_element_type=jnp.float32)

        o_ref[bi] = (x + gamma * fused).astype(o_ref.dtype)


def raindrop_edge_enhancer(x_nchw, params, enabled=True, images_per_step=None):
    """Forward pass.  x_nchw: (B, C, H, W), same convention as the nn.Module."""
    if not enabled:
        return x_nchw
    B, C, H, W = x_nchw.shape
    HW = H * W
    we1, be1, we2, be2, wh1, bh1, wh2, bh2, wf, bf, gamma = params

    # Keep NCHW; flattening H*W onto the lane axis is a pure metadata reshape.
    x = x_nchw.reshape(B, C, HW)

    def w3(w):    # HWIO (3,3,Ci,Co) -> (9, Co, Ci), tap index = ky*3 + kx
        return jnp.transpose(w, (0, 1, 3, 2)).reshape(9, C, C)

    def w1(w):    # (1,1,Ci,Co) -> (Co, Ci)
        return jnp.transpose(w[0, 0], (1, 0))

    def bcol(b):  # (1,C) -> (C,1) so it broadcasts along the lane (HW) axis
        return b.reshape(C, 1).astype(jnp.float32)

    wf2 = jnp.transpose(wf[0, 0], (1, 0))                 # (C, 2C)
    p = jnp.arange(HW, dtype=jnp.int32)
    coords = jnp.stack([p % W, p // W], axis=0)           # (2, HW): col, row

    tensor_args = (
        coords,
        w3(we1), bcol(be1),
        w3(we2), bcol(be2),
        w1(wh1), bcol(bh1),
        w3(wh2), bcol(bh2),
        wf2[:, :C], wf2[:, C:], bcol(bf),
    )
    gamma_smem = gamma.reshape(1, 1).astype(jnp.float32)

    # ---- images per grid step --------------------------------------------
    per_image_live = 12 * C * HW * 4          # rough live f32 working set / image
    if images_per_step is None:
        bt = 1
        for cand in range(1, B + 1):
            if B % cand:
                continue
            if B >= 2 and B // cand < 2:      # keep >= 2 steps so the "parallel"
                continue                      # batch axis can feed both v7x TCs
            if cand * per_image_live <= 24 * 2**20:
                bt = cand
    else:
        bt = images_per_step
        assert B % bt == 0
    grid = (B // bt,)

    # ---- derive the VMEM limit from the actual working set ----------------
    io_block = bt * C * HW * 4
    param_bytes = sum(int(a.size) * 4 for a in tensor_args)
    need = 2 * 2 * io_block + param_bytes + bt * per_image_live
    vmem_limit = int(min(max(2 * need, 8 * 2**20), 48 * 2**20))   # v7x-safe cap

    def full_spec(a):
        idx = (0,) * a.ndim                   # block-index-invariant: weights /
        return pl.BlockSpec(a.shape, lambda b, _i=idx: _i)  # coords not re-DMAed

    in_specs = [pl.BlockSpec((bt, C, HW), lambda b: (b, 0, 0))]
    in_specs += [full_spec(a) for a in tensor_args]
    in_specs += [pl.BlockSpec(memory_space=pltpu.MemorySpace.SMEM)]   # gamma

    kernel = functools.partial(raindrop_edge_enhancer_kernel, H=H, W=W)

    out = pl.pallas_call(
        kernel,
        out_shape=jax.ShapeDtypeStruct((B, C, HW), x.dtype),
        grid_spec=pltpu.PrefetchScalarGridSpec(
            num_scalar_prefetch=0,
            grid=grid,
            in_specs=in_specs,
            out_specs=pl.BlockSpec((bt, C, HW), lambda b: (b, 0, 0)),
        ),
        compiler_params=pltpu.CompilerParams(
            dimension_semantics=("parallel",),   # shard batch across v7x TCs
            vmem_limit_bytes=vmem_limit,
        ),
    )(x, *tensor_args, gamma_smem)
    return out.reshape(B, C, H, W)


def init_params(key, dim):
    """Deterministic synthetic parameters (HWIO conv layout, biases as (1,C))."""
    ks = jax.random.split(key, 10)
    s = 0.1
    we1 = s * jax.random.normal(ks[0], (3, 3, dim, dim), jnp.float32)
    be1 = s * jax.random.normal(ks[1], (1, dim), jnp.float32)
    we2 = s * jax.random.normal(ks[2], (3, 3, dim, dim), jnp.float32)
    be2 = s * jax.random.normal(ks[3], (1, dim), jnp.float32)
    wh1 = s * jax.random.normal(ks[4], (1, 1, dim, dim), jnp.float32)
    bh1 = s * jax.random.normal(ks[5], (1, dim), jnp.float32)
    wh2 = s * jax.random.normal(ks[6], (3, 3, dim, dim), jnp.float32)
    bh2 = s * jax.random.normal(ks[7], (1, dim), jnp.float32)
    wf = s * jax.random.normal(ks[8], (1, 1, 2 * dim, dim), jnp.float32)
    bf = s * jax.random.normal(ks[9], (1, dim), jnp.float32)
    # nn.Module inits gamma = 0; use 0.5 here so the residual branch is exercised.
    gamma = jnp.full((1,), 0.5, jnp.float32)
    return (we1, be1, we2, be2, wh1, bh1, wh2, bh2, wf, bf, gamma)


def ref_forward(x_nchw, params, enabled=True):
    """Pure-JAX (XLA conv) reference of the PyTorch forward, NCHW."""
    if not enabled:
        return x_nchw
    we1, be1, we2, be2, wh1, bh1, wh2, bh2, wf, bf, gamma = params

    def conv(x, w_hwio, b, pad, dil=1):
        w = jnp.transpose(w_hwio, (3, 2, 0, 1))          # OIHW
        y = jax.lax.conv_general_dilated(
            x, w, window_strides=(1, 1),
            padding=((pad, pad), (pad, pad)), rhs_dilation=(dil, dil),
            dimension_numbers=('NCHW', 'OIHW', 'NCHW'))
        return y + b.reshape(1, -1, 1, 1)

    gelu = lambda v: jax.nn.gelu(v, approximate=False)
    e = conv(x_nchw, we1, be1, 1)
    e = gelu(e)
    e = conv(e, we2, be2, 2, dil=2)
    h = conv(x_nchw, wh1, bh1, 0)
    h = gelu(h)
    h = conv(h, wh2, bh2, 1)
    cat = jnp.concatenate([e, h], axis=1)
    fused = conv(cat, wf, bf, 0)
    return x_nchw + gamma.reshape(()) * fused


if __name__ == "__main__":
    key = jax.random.PRNGKey(0)
    kx, kp = jax.random.split(key)

    B, C, H, W = 2, 4, 16, 16                            # dim = 4
    x = jax.random.normal(kx, (B, C, H, W), jnp.float32)
    params = init_params(kp, C)

    out = raindrop_edge_enhancer(x, params, enabled=True)
    out = jax.block_until_ready(out)

    ref = jax.block_until_ready(ref_forward(x, params, enabled=True))
    assert out.shape == x.shape and out.dtype == x.dtype
    assert jnp.allclose(out, ref, rtol=1e-4, atol=1e-4), (
        float(jnp.max(jnp.abs(out - ref))))

    # enabled=False path is the identity, same as the nn.Module
    assert jnp.array_equal(raindrop_edge_enhancer(x, params, enabled=False), x)

    print("KERNEL_OK")
</pallas_src>

<mosaic_0001>
module attributes {stable_mosaic.version = 11 : i64} {
  func.func @raindrop_edge_enhancer_kernel(%arg0: i32, %arg1: memref<1x4x256xf32, #tpu.memory_space<vmem>>, %arg2: memref<2x256xi32, #tpu.memory_space<vmem>>, %arg3: memref<9x4x4xf32, #tpu.memory_space<vmem>>, %arg4: memref<4x1xf32, #tpu.memory_space<vmem>>, %arg5: memref<9x4x4xf32, #tpu.memory_space<vmem>>, %arg6: memref<4x1xf32, #tpu.memory_space<vmem>>, %arg7: memref<4x4xf32, #tpu.memory_space<vmem>>, %arg8: memref<4x1xf32, #tpu.memory_space<vmem>>, %arg9: memref<9x4x4xf32, #tpu.memory_space<vmem>>, %arg10: memref<4x1xf32, #tpu.memory_space<vmem>>, %arg11: memref<4x4xf32, #tpu.memory_space<vmem>>, %arg12: memref<4x4xf32, #tpu.memory_space<vmem>>, %arg13: memref<4x1xf32, #tpu.memory_space<vmem>>, %arg14: memref<1x1xf32, #tpu.memory_space<smem>>, %arg15: memref<1x4x256xf32, #tpu.memory_space<vmem>>) attributes {dimension_semantics = [#tpu.dimension_semantics<parallel>], iteration_bounds = array<i64: 2>, scalar_prefetch = 0 : i64, scratch_operands = 0 : i64, tpu.core_type = #tpu.core_type<tc>, window_params = [{transform_indices = @transform_0, window_bounds = array<i64: 1, 4, 256>}, {pipeline_mode = #tpu.pipeline_mode<synchronous>, transform_indices = @transform_1, window_bounds = array<i64: 2, 256>}, {pipeline_mode = #tpu.pipeline_mode<synchronous>, transform_indices = @transform_2, window_bounds = array<i64: 9, 4, 4>}, {pipeline_mode = #tpu.pipeline_mode<synchronous>, transform_indices = @transform_3, window_bounds = array<i64: 4, 1>}, {pipeline_mode = #tpu.pipeline_mode<synchronous>, transform_indices = @transform_4, window_bounds = array<i64: 9, 4, 4>}, {pipeline_mode = #tpu.pipeline_mode<synchronous>, transform_indices = @transform_5, window_bounds = array<i64: 4, 1>}, {pipeline_mode = #tpu.pipeline_mode<synchronous>, transform_indices = @transform_6, window_bounds = array<i64: 4, 4>}, {pipeline_mode = #tpu.pipeline_mode<synchronous>, transform_indices = @transform_7, window_bounds = array<i64: 4, 1>}, {pipeline_mode = #tpu.pipeline_mode<synchronous>, transform_indices = @transform_8, window_bounds = array<i64: 9, 4, 4>}, {pipeline_mode = #tpu.pipeline_mode<synchronous>, transform_indices = @transform_9, window_bounds = array<i64: 4, 1>}, {pipeline_mode = #tpu.pipeline_mode<synchronous>, transform_indices = @transform_10, window_bounds = array<i64: 4, 4>}, {pipeline_mode = #tpu.pipeline_mode<synchronous>, transform_indices = @transform_11, window_bounds = array<i64: 4, 4>}, {pipeline_mode = #tpu.pipeline_mode<synchronous>, transform_indices = @transform_12, window_bounds = array<i64: 4, 1>}, {transform_indices = @transform_13, window_bounds = array<i64: 1, 1>}, {transform_indices = @transform_14, window_bounds = array<i64: 1, 4, 256>}]} {
    %c0 = arith.constant 0 : index
    %c0_0 = arith.constant 0 : index
    %0 = memref.load %arg14[%c0, %c0_0] : memref<1x1xf32, #tpu.memory_space<smem>>
    %c0_1 = arith.constant 0 : index
    %c0_2 = arith.constant 0 : index
    %1 = vector.load %arg2[%c0_1, %c0_2] : memref<2x256xi32, #tpu.memory_space<vmem>>, vector<1x256xi32>
    %c1 = arith.constant 1 : index
    %c0_3 = arith.constant 0 : index
    %2 = vector.load %arg2[%c1, %c0_3] : memref<2x256xi32, #tpu.memory_space<vmem>>, vector<1x256xi32>
    %c-2_i32 = arith.constant -2 : i32
    %3 = vector.broadcast %c-2_i32 : i32 to vector<1x256xi32>
    %4 = arith.addi %1, %3 : vector<1x256xi32>
    %c0_i32 = arith.constant 0 : i32
    %5 = vector.broadcast %c0_i32 : i32 to vector<1x256xi32>
    %6 = arith.cmpi sge, %4, %5 : vector<1x256xi32>
    %c-2_i32_4 = arith.constant -2 : i32
    %7 = vector.broadcast %c-2_i32_4 : i32 to vector<1x256xi32>
    %8 = arith.addi %1, %7 : vector<1x256xi32>
    %c16_i32 = arith.constant 16 : i32
    %9 = vector.broadcast %c16_i32 : i32 to vector<1x256xi32>
    %10 = arith.cmpi slt, %8, %9 : vector<1x256xi32>
    %11 = arith.andi %6, %10 : vector<1x256xi1>
    %cst = arith.constant 1.000000e+00 : f32
    %cst_5 = arith.constant 0.000000e+00 : f32
    %12 = vector.broadcast %cst : f32 to vector<1x256xf32>
    %13 = vector.broadcast %cst_5 : f32 to vector<1x256xf32>
    %14 = arith.select %11, %12, %13 : vector<1x256xi1>, vector<1x256xf32>
    %c-1_i32 = arith.constant -1 : i32
    %15 = vector.broadcast %c-1_i32 : i32 to vector<1x256xi32>
    %16 = arith.addi %1, %15 : vector<1x256xi32>
    %c0_i32_6 = arith.constant 0 : i32
    %17 = vector.broadcast %c0_i32_6 : i32 to vector<1x256xi32>
    %18 = arith.cmpi sge, %16, %17 : vector<1x256xi32>
    %c-1_i32_7 = arith.constant -1 : i32
    %19 = vector.broadcast %c-1_i32_7 : i32 to vector<1x256xi32>
    %20 = arith.addi %1, %19 : vector<1x256xi32>
    %c16_i32_8 = arith.constant 16 : i32
    %21 = vector.broadcast %c16_i32_8 : i32 to vector<1x256xi32>
    %22 = arith.cmpi slt, %20, %21 : vector<1x256xi32>
    %23 = arith.andi %18, %22 : vector<1x256xi1>
    %cst_9 = arith.constant 1.000000e+00 : f32
    %cst_10 = arith.constant 0.000000e+00 : f32
    %24 = vector.broadcast %cst_9 : f32 to vector<1x256xf32>
    %25 = vector.broadcast %cst_10 : f32 to vector<1x256xf32>
    %26 = arith.select %23, %24, %25 : vector<1x256xi1>, vector<1x256xf32>
    %c1_i32 = arith.constant 1 : i32
    %27 = vector.broadcast %c1_i32 : i32 to vector<1x256xi32>
    %28 = arith.addi %1, %27 : vector<1x256xi32>
    %c0_i32_11 = arith.constant 0 : i32
    %29 = vector.broadcast %c0_i32_11 : i32 to vector<1x256xi32>
    %30 = arith.cmpi sge, %28, %29 : vector<1x256xi32>
    %c1_i32_12 = arith.constant 1 : i32
    %31 = vector.broadcast %c1_i32_12 : i32 to vector<1x256xi32>
    %32 = arith.addi %1, %31 : vector<1x256xi32>
    %c16_i32_13 = arith.constant 16 : i32
    %33 = vector.broadcast %c16_i32_13 : i32 to vector<1x256xi32>
    %34 = arith.cmpi slt, %32, %33 : vector<1x256xi32>
    %35 = arith.andi %30, %34 : vector<1x256xi1>
    %cst_14 = arith.constant 1.000000e+00 : f32
    %cst_15 = arith.constant 0.000000e+00 : f32
    %36 = vector.broadcast %cst_14 : f32 to vector<1x256xf32>
    %37 = vector.broadcast %cst_15 : f32 to vector<1x256xf32>
    %38 = arith.select %35, %36, %37 : vector<1x256xi1>, vector<1x256xf32>
    %c2_i32 = arith.constant 2 : i32
    %39 = vector.broadcast %c2_i32 : i32 to vector<1x256xi32>
    %40 = arith.addi %1, %39 : vector<1x256xi32>
    %c0_i32_16 = arith.constant 0 : i32
    %41 = vector.broadcast %c0_i32_16 : i32 to vector<1x256xi32>
    %42 = arith.cmpi sge, %40, %41 : vector<1x256xi32>
    %c2_i32_17 = arith.constant 2 : i32
    %43 = vector.broadcast %c2_i32_17 : i32 to vector<1x256xi32>
    %44 = arith.addi %1, %43 : vector<1x256xi32>
    %c16_i32_18 = arith.constant 16 : i32
    %45 = vector.broadcast %c16_i32_18 : i32 to vector<1x256xi32>
    %46 = arith.cmpi slt, %44, %45 : vector<1x256xi32>
    %47 = arith.andi %42, %46 : vector<1x256xi1>
    %cst_19 = arith.constant 1.000000e+00 : f32
    %cst_20 = arith.constant 0.000000e+00 : f32
    %48 = vector.broadcast %cst_19 : f32 to vector<1x256xf32>
    %49 = vector.broadcast %cst_20 : f32 to vector<1x256xf32>
    %50 = arith.select %47, %48, %49 : vector<1x256xi1>, vector<1x256xf32>
    %c-2_i32_21 = arith.constant -2 : i32
    %51 = vector.broadcast %c-2_i32_21 : i32 to vector<1x256xi32>
    %52 = arith.addi %2, %51 : vector<1x256xi32>
    %c0_i32_22 = arith.constant 0 : i32
    %53 = vector.broadcast %c0_i32_22 : i32 to vector<1x256xi32>
    %54 = arith.cmpi sge, %52, %53 : vector<1x256xi32>
    %c-2_i32_23 = arith.constant -2 : i32
    %55 = vector.broadcast %c-2_i32_23 : i32 to vector<1x256xi32>
    %56 = arith.addi %2, %55 : vector<1x256xi32>
    %c16_i32_24 = arith.constant 16 : i32
    %57 = vector.broadcast %c16_i32_24 : i32 to vector<1x256xi32>
    %58 = arith.cmpi slt, %56, %57 : vector<1x256xi32>
    %59 = arith.andi %54, %58 : vector<1x256xi1>
    %cst_25 = arith.constant 1.000000e+00 : f32
    %cst_26 = arith.constant 0.000000e+00 : f32
    %60 = vector.broadcast %cst_25 : f32 to vector<1x256xf32>
    %61 = vector.broadcast %cst_26 : f32 to vector<1x256xf32>
    %62 = arith.select %59, %60, %61 : vector<1x256xi1>, vector<1x256xf32>
    %c-1_i32_27 = arith.constant -1 : i32
    %63 = vector.broadcast %c-1_i32_27 : i32 to vector<1x256xi32>
    %64 = arith.addi %2, %63 : vector<1x256xi32>
    %c0_i32_28 = arith.constant 0 : i32
    %65 = vector.broadcast %c0_i32_28 : i32 to vector<1x256xi32>
    %66 = arith.cmpi sge, %64, %65 : vector<1x256xi32>
    %c-1_i32_29 = arith.constant -1 : i32
    %67 = vector.broadcast %c-1_i32_29 : i32 to vector<1x256xi32>
    %68 = arith.addi %2, %67 : vector<1x256xi32>
    %c16_i32_30 = arith.constant 16 : i32
    %69 = vector.broadcast %c16_i32_30 : i32 to vector<1x256xi32>
    %70 = arith.cmpi slt, %68, %69 : vector<1x256xi32>
    %71 = arith.andi %66, %70 : vector<1x256xi1>
    %cst_31 = arith.constant 1.000000e+00 : f32
    %cst_32 = arith.constant 0.000000e+00 : f32
    %72 = vector.broadcast %cst_31 : f32 to vector<1x256xf32>
    %73 = vector.broadcast %cst_32 : f32 to vector<1x256xf32>
    %74 = arith.select %71, %72, %73 : vector<1x256xi1>, vector<1x256xf32>
    %c1_i32_33 = arith.constant 1 : i32
    %75 = vector.broadcast %c1_i32_33 : i32 to vector<1x256xi32>
    %76 = arith.addi %2, %75 : vector<1x256xi32>
    %c0_i32_34 = arith.constant 0 : i32
    %77 = vector.broadcast %c0_i32_34 : i32 to vector<1x256xi32>
    %78 = arith.cmpi sge, %76, %77 : vector<1x256xi32>
    %c1_i32_35 = arith.constant 1 : i32
    %79 = vector.broadcast %c1_i32_35 : i32 to vector<1x256xi32>
    %80 = arith.addi %2, %79 : vector<1x256xi32>
    %c16_i32_36 = arith.constant 16 : i32
    %81 = vector.broadcast %c16_i32_36 : i32 to vector<1x256xi32>
    %82 = arith.cmpi slt, %80, %81 : vector<1x256xi32>
    %83 = arith.andi %78, %82 : vector<1x256xi1>
    %cst_37 = arith.constant 1.000000e+00 : f32
    %cst_38 = arith.constant 0.000000e+00 : f32
    %84 = vector.broadcast %cst_37 : f32 to vector<1x256xf32>
    %85 = vector.broadcast %cst_38 : f32 to vector<1x256xf32>
    %86 = arith.select %83, %84, %85 : vector<1x256xi1>, vector<1x256xf32>
    %c2_i32_39 = arith.constant 2 : i32
    %87 = vector.broadcast %c2_i32_39 : i32 to vector<1x256xi32>
    %88 = arith.addi %2, %87 : vector<1x256xi32>
    %c0_i32_40 = arith.constant 0 : i32
    %89 = vector.broadcast %c0_i32_40 : i32 to vector<1x256xi32>
    %90 = arith.cmpi sge, %88, %89 : vector<1x256xi32>
    %c2_i32_41 = arith.constant 2 : i32
    %91 = vector.broadcast %c2_i32_41 : i32 to vector<1x256xi32>
    %92 = arith.addi %2, %91 : vector<1x256xi32>
    %c16_i32_42 = arith.constant 16 : i32
    %93 = vector.broadcast %c16_i32_42 : i32 to vector<1x256xi32>
    %94 = arith.cmpi slt, %92, %93 : vector<1x256xi32>
    %95 = arith.andi %90, %94 : vector<1x256xi1>
    %cst_43 = arith.constant 1.000000e+00 : f32
    %cst_44 = arith.constant 0.000000e+00 : f32
    %96 = vector.broadcast %cst_43 : f32 to vector<1x256xf32>
    %97 = vector.broadcast %cst_44 : f32 to vector<1x256xf32>
    %98 = arith.select %95, %96, %97 : vector<1x256xi1>, vector<1x256xf32>
    %99 = arith.mulf %74, %26 : vector<1x256xf32>
    %100 = arith.mulf %74, %38 : vector<1x256xf32>
    %101 = arith.mulf %86, %26 : vector<1x256xf32>
    %102 = arith.mulf %86, %38 : vector<1x256xf32>
    %103 = arith.mulf %62, %14 : vector<1x256xf32>
    %104 = arith.mulf %62, %50 : vector<1x256xf32>
    %105 = arith.mulf %98, %14 : vector<1x256xf32>
    %106 = arith.mulf %98, %50 : vector<1x256xf32>
    %c0_45 = arith.constant 0 : index
    %c0_46 = arith.constant 0 : index
    %c0_47 = arith.constant 0 : index
    %107 = vector.load %arg1[%c0_45, %c0_46, %c0_47] : memref<1x4x256xf32, #tpu.memory_space<vmem>>, vector<1x4x256xf32>
    %108 = vector.shape_cast %107 : vector<1x4x256xf32> to vector<4x256xf32>
    %c0_48 = arith.constant 0 : index
    %c0_49 = arith.constant 0 : index
    %c0_50 = arith.constant 0 : index
    %109 = vector.load %arg3[%c0_48, %c0_49, %c0_50] : memref<9x4x4xf32, #tpu.memory_space<vmem>>, vector<1x4x4xf32>
    %110 = vector.shape_cast %109 : vector<1x4x4xf32> to vector<4x4xf32>
    %c17_i32 = arith.constant 17 : i32
    %111 = tpu.dynamic_rotate %108 by %c17_i32 dim 1 : vector<4x256xf32>, i32 -> vector<4x256xf32>
    %112 = vector.broadcast %99 : vector<1x256xf32> to vector<4x256xf32>
    %113 = arith.mulf %111, %112 : vector<4x256xf32>
    %cst_51 = arith.constant dense<0.000000e+00> : vector<4x256xf32>
    %114 = tpu.matmul %110, %113, %cst_51 {dimension_numbers = #tpu.dot_dimension_numbers<[1], [0], [0], [1], [0, 0, 1, 1], [], []>} : vector<4x4xf32>, vector<4x256xf32>, vector<4x256xf32> -> vector<4x256xf32>
    %c1_52 = arith.constant 1 : index
    %c0_53 = arith.constant 0 : index
    %c0_54 = arith.constant 0 : index
    %115 = vector.load %arg3[%c1_52, %c0_53, %c0_54] : memref<9x4x4xf32, #tpu.memory_space<vmem>>, vector<1x4x4xf32>
    %116 = vector.shape_cast %115 : vector<1x4x4xf32> to vector<4x4xf32>
    %c16_i32_55 = arith.constant 16 : i32
    %117 = tpu.dynamic_rotate %108 by %c16_i32_55 dim 1 : vector<4x256xf32>, i32 -> vector<4x256xf32>
    %118 = vector.broadcast %74 : vector<1x256xf32> to vector<4x256xf32>
    %119 = arith.mulf %117, %118 : vector<4x256xf32>
    %cst_56 = arith.constant dense<0.000000e+00> : vector<4x256xf32>
    %120 = tpu.matmul %116, %119, %cst_56 {dimension_numbers = #tpu.dot_dimension_numbers<[1], [0], [0], [1], [0, 0, 1, 1], [], []>} : vector<4x4xf32>, vector<4x256xf32>, vector<4x256xf32> -> vector<4x256xf32>
    %121 = arith.addf %114, %120 : vector<4x256xf32>
    %c2 = arith.constant 2 : index
    %c0_57 = arith.constant 0 : index
    %c0_58 = arith.constant 0 : index
    %122 = vector.load %arg3[%c2, %c0_57, %c0_58] : memref<9x4x4xf32, #tpu.memory_space<vmem>>, vector<1x4x4xf32>
    %123 = vector.shape_cast %122 : vector<1x4x4xf32> to vector<4x4xf32>
    %c15_i32 = arith.constant 15 : i32
    %124 = tpu.dynamic_rotate %108 by %c15_i32 dim 1 : vector<4x256xf32>, i32 -> vector<4x256xf32>
    %125 = vector.broadcast %100 : vector<1x256xf32> to vector<4x256xf32>
    %126 = arith.mulf %124, %125 : vector<4x256xf32>
    %cst_59 = arith.constant dense<0.000000e+00> : vector<4x256xf32>
    %127 = tpu.matmul %123, %126, %cst_59 {dimension_numbers = #tpu.dot_dimension_numbers<[1], [0], [0], [1], [0, 0, 1, 1], [], []>} : vector<4x4xf32>, vector<4x256xf32>, vector<4x256xf32> -> vector<4x256xf32>
    %128 = arith.addf %121, %127 : vector<4x256xf32>
    %c3 = arith.constant 3 : index
    %c0_60 = arith.constant 0 : index
    %c0_61 = arith.constant 0 : index
    %129 = vector.load %arg3[%c3, %c0_60, %c0_61] : memref<9x4x4xf32, #tpu.memory_space<vmem>>, vector<1x4x4xf32>
    %130 = vector.shape_cast %129 : vector<1x4x4xf32> to vector<4x4xf32>
    %c1_i32_62 = arith.constant 1 : i32
    %131 = tpu.dynamic_rotate %108 by %c1_i32_62 dim 1 : vector<4x256xf32>, i32 -> vector<4x256xf32>
    %132 = vector.broadcast %26 : vector<1x256xf32> to vector<4x256xf32>
    %133 = arith.mulf %131, %132 : vector<4x256xf32>
    %cst_63 = arith.constant dense<0.000000e+00> : vector<4x256xf32>
    %134 = tpu.matmul %130, %133, %cst_63 {dimension_numbers = #tpu.dot_dimension_numbers<[1], [0], [0], [1], [0, 0, 1, 1], [], []>} : vector<4x4xf32>, vector<4x256xf32>, vector<4x256xf32> -> vector<4x256xf32>
    %135 = arith.addf %128, %134 : vector<4x256xf32>
    %c4 = arith.constant 4 : index
    %c0_64 = arith.constant 0 : index
    %c0_65 = arith.constant 0 : index
    %136 = vector.load %arg3[%c4, %c0_64, %c0_65] : memref<9x4x4xf32, #tpu.memory_space<vmem>>, vector<1x4x4xf32>
    %137 = vector.shape_cast %136 : vector<1x4x4xf32> to vector<4x4xf32>
    %cst_66 = arith.constant dense<0.000000e+00> : vector<4x256xf32>
    %138 = tpu.matmul %137, %108, %cst_66 {dimension_numbers = #tpu.dot_dimension_numbers<[1], [0], [0], [1], [0, 0, 1, 1], [], []>} : vector<4x4xf32>, vector<4x256xf32>, vector<4x256xf32> -> vector<4x256xf32>
    %139 = arith.addf %135, %138 : vector<4x256xf32>
    %c5 = arith.constant 5 : index
    %c0_67 = arith.constant 0 : index
    %c0_68 = arith.constant 0 : index
    %140 = vector.load %arg3[%c5, %c0_67, %c0_68] : memref<9x4x4xf32, #tpu.memory_space<vmem>>, vector<1x4x4xf32>
    %141 = vector.shape_cast %140 : vector<1x4x4xf32> to vector<4x4xf32>
    %c255_i32 = arith.constant 255 : i32
    %142 = tpu.dynamic_rotate %108 by %c255_i32 dim 1 : vector<4x256xf32>, i32 -> vector<4x256xf32>
    %143 = vector.broadcast %38 : vector<1x256xf32> to vector<4x256xf32>
    %144 = arith.mulf %142, %143 : vector<4x256xf32>
    %cst_69 = arith.constant dense<0.000000e+00> : vector<4x256xf32>
    %145 = tpu.matmul %141, %144, %cst_69 {dimension_numbers = #tpu.dot_dimension_numbers<[1], [0], [0], [1], [0, 0, 1, 1], [], []>} : vector<4x4xf32>, vector<4x256xf32>, vector<4x256xf32> -> vector<4x256xf32>
    %146 = arith.addf %139, %145 : vector<4x256xf32>
    %c6 = arith.constant 6 : index
    %c0_70 = arith.constant 0 : index
    %c0_71 = arith.constant 0 : index
    %147 = vector.load %arg3[%c6, %c0_70, %c0_71] : memref<9x4x4xf32, #tpu.memory_space<vmem>>, vector<1x4x4xf32>
    %148 = vector.shape_cast %147 : vector<1x4x4xf32> to vector<4x4xf32>
    %c241_i32 = arith.constant 241 : i32
    %149 = tpu.dynamic_rotate %108 by %c241_i32 dim 1 : vector<4x256xf32>, i32 -> vector<4x256xf32>
    %150 = vector.broadcast %101 : vector<1x256xf32> to vector<4x256xf32>
    %151 = arith.mulf %149, %150 : vector<4x256xf32>
    %cst_72 = arith.constant dense<0.000000e+00> : vector<4x256xf32>
    %152 = tpu.matmul %148, %151, %cst_72 {dimension_numbers = #tpu.dot_dimension_numbers<[1], [0], [0], [1], [0, 0, 1, 1], [], []>} : vector<4x4xf32>, vector<4x256xf32>, vector<4x256xf32> -> vector<4x256xf32>
    %153 = arith.addf %146, %152 : vector<4x256xf32>
    %c7 = arith.constant 7 : index
    %c0_73 = arith.constant 0 : index
    %c0_74 = arith.constant 0 : index
    %154 = vector.load %arg3[%c7, %c0_73, %c0_74] : memref<9x4x4xf32, #tpu.memory_space<vmem>>, vector<1x4x4xf32>
    %155 = vector.shape_cast %154 : vector<1x4x4xf32> to vector<4x4xf32>
    %c240_i32 = arith.constant 240 : i32
    %156 = tpu.dynamic_rotate %108 by %c240_i32 dim 1 : vector<4x256xf32>, i32 -> vector<4x256xf32>
    %157 = vector.broadcast %86 : vector<1x256xf32> to vector<4x256xf32>
    %158 = arith.mulf %156, %157 : vector<4x256xf32>
    %cst_75 = arith.constant dense<0.000000e+00> : vector<4x256xf32>
    %159 = tpu.matmul %155, %158, %cst_75 {dimension_numbers = #tpu.dot_dimension_numbers<[1], [0], [0], [1], [0, 0, 1, 1], [], []>} : vector<4x4xf32>, vector<4x256xf32>, vector<4x256xf32> -> vector<4x256xf32>
    %160 = arith.addf %153, %159 : vector<4x256xf32>
    %c8 = arith.constant 8 : index
    %c0_76 = arith.constant 0 : index
    %c0_77 = arith.constant 0 : index
    %161 = vector.load %arg3[%c8, %c0_76, %c0_77] : memref<9x4x4xf32, #tpu.memory_space<vmem>>, vector<1x4x4xf32>
    %162 = vector.shape_cast %161 : vector<1x4x4xf32> to vector<4x4xf32>
    %c239_i32 = arith.constant 239 : i32
    %163 = tpu.dynamic_rotate %108 by %c239_i32 dim 1 : vector<4x256xf32>, i32 -> vector<4x256xf32>
    %164 = vector.broadcast %102 : vector<1x256xf32> to vector<4x256xf32>
    %165 = arith.mulf %163, %164 : vector<4x256xf32>
    %cst_78 = arith.constant dense<0.000000e+00> : vector<4x256xf32>
    %166 = tpu.matmul %162, %165, %cst_78 {dimension_numbers = #tpu.dot_dimension_numbers<[1], [0], [0], [1], [0, 0, 1, 1], [], []>} : vector<4x4xf32>, vector<4x256xf32>, vector<4x256xf32> -> vector<4x256xf32>
    %167 = arith.addf %160, %166 : vector<4x256xf32>
    %c0_79 = arith.constant 0 : index
    %c0_80 = arith.constant 0 : index
    %168 = vector.load %arg4[%c0_79, %c0_80] : memref<4x1xf32, #tpu.memory_space<vmem>>, vector<4x1xf32>
    %169 = vector.broadcast %168 : vector<4x1xf32> to vector<4x256xf32>
    %170 = arith.addf %167, %169 : vector<4x256xf32>
    %cst_81 = arith.constant 5.000000e-01 : f32
    %171 = vector.broadcast %cst_81 : f32 to vector<4x256xf32>
    %172 = arith.mulf %171, %170 : vector<4x256xf32>
    %cst_82 = arith.constant 0.707106769 : f32
    %173 = vector.broadcast %cst_82 : f32 to vector<4x256xf32>
    %174 = arith.mulf %170, %173 : vector<4x256xf32>
    %175 = math.erf %174 : vector<4x256xf32>
    %cst_83 = arith.constant 1.000000e+00 : f32
    %176 = vector.broadcast %cst_83 : f32 to vector<4x256xf32>
    %177 = arith.addf %176, %175 : vector<4x256xf32>
    %178 = arith.mulf %172, %177 : vector<4x256xf32>
    %c0_84 = arith.constant 0 : index
    %c0_85 = arith.constant 0 : index
    %c0_86 = arith.constant 0 : index
    %179 = vector.load %arg5[%c0_84, %c0_85, %c0_86] : memref<9x4x4xf32, #tpu.memory_space<vmem>>, vector<1x4x4xf32>
    %180 = vector.shape_cast %179 : vector<1x4x4xf32> to vector<4x4xf32>
    %c34_i32 = arith.constant 34 : i32
    %181 = tpu.dynamic_rotate %178 by %c34_i32 dim 1 : vector<4x256xf32>, i32 -> vector<4x256xf32>
    %182 = vector.broadcast %103 : vector<1x256xf32> to vector<4x256xf32>
    %183 = arith.mulf %181, %182 : vector<4x256xf32>
    %cst_87 = arith.constant dense<0.000000e+00> : vector<4x256xf32>
    %184 = tpu.matmul %180, %183, %cst_87 {dimension_numbers = #tpu.dot_dimension_numbers<[1], [0], [0], [1], [0, 0, 1, 1], [], []>} : vector<4x4xf32>, vector<4x256xf32>, vector<4x256xf32> -> vector<4x256xf32>
    %c1_88 = arith.constant 1 : index
    %c0_89 = arith.constant 0 : index
    %c0_90 = arith.constant 0 : index
    %185 = vector.load %arg5[%c1_88, %c0_89, %c0_90] : memref<9x4x4xf32, #tpu.memory_space<vmem>>, vector<1x4x4xf32>
    %186 = vector.shape_cast %185 : vector<1x4x4xf32> to vector<4x4xf32>
    %c32_i32 = arith.constant 32 : i32
    %187 = tpu.dynamic_rotate %178 by %c32_i32 dim 1 : vector<4x256xf32>, i32 -> vector<4x256xf32>
    %188 = vector.broadcast %62 : vector<1x256xf32> to vector<4x256xf32>
    %189 = arith.mulf %187, %188 : vector<4x256xf32>
    %cst_91 = arith.constant dense<0.000000e+00> : vector<4x256xf32>
    %190 = tpu.matmul %186, %189, %cst_91 {dimension_numbers = #tpu.dot_dimension_numbers<[1], [0], [0], [1], [0, 0, 1, 1], [], []>} : vector<4x4xf32>, vector<4x256xf32>, vector<4x256xf32> -> vector<4x256xf32>
    %191 = arith.addf %184, %190 : vector<4x256xf32>
    %c2_92 = arith.constant 2 : index
    %c0_93 = arith.constant 0 : index
    %c0_94 = arith.constant 0 : index
    %192 = vector.load %arg5[%c2_92, %c0_93, %c0_94] : memref<9x4x4xf32, #tpu.memory_space<vmem>>, vector<1x4x4xf32>
    %193 = vector.shape_cast %192 : vector<1x4x4xf32> to vector<4x4xf32>
    %c30_i32 = arith.constant 30 : i32
    %194 = tpu.dynamic_rotate %178 by %c30_i32 dim 1 : vector<4x256xf32>, i32 -> vector<4x256xf32>
    %195 = vector.broadcast %104 : vector<1x256xf32> to vector<4x256xf32>
    %196 = arith.mulf %194, %195 : vector<4x256xf32>
    %cst_95 = arith.constant dense<0.000000e+00> : vector<4x256xf32>
    %197 = tpu.matmul %193, %196, %cst_95 {dimension_numbers = #tpu.dot_dimension_numbers<[1], [0], [0], [1], [0, 0, 1, 1], [], []>} : vector<4x4xf32>, vector<4x256xf32>, vector<4x256xf32> -> vector<4x256xf32>
    %198 = arith.addf %191, %197 : vector<4x256xf32>
    %c3_96 = arith.constant 3 : index
    %c0_97 = arith.constant 0 : index
    %c0_98 = arith.constant 0 : index
    %199 = vector.load %arg5[%c3_96, %c0_97, %c0_98] : memref<9x4x4xf32, #tpu.memory_space<vmem>>, vector<1x4x4xf32>
    %200 = vector.shape_cast %199 : vector<1x4x4xf32> to vector<4x4xf32>
    %c2_i32_99 = arith.constant 2 : i32
    %201 = tpu.dynamic_rotate %178 by %c2_i32_99 dim 1 : vector<4x256xf32>, i32 -> vector<4x256xf32>
    %202 = vector.broadcast %14 : vector<1x256xf32> to vector<4x256xf32>
    %203 = arith.mulf %201, %202 : vector<4x256xf32>
    %cst_100 = arith.constant dense<0.000000e+00> : vector<4x256xf32>
    %204 = tpu.matmul %200, %203, %cst_100 {dimension_numbers = #tpu.dot_dimension_numbers<[1], [0], [0], [1], [0, 0, 1, 1], [], []>} : vector<4x4xf32>, vector<4x256xf32>, vector<4x256xf32> -> vector<4x256xf32>
    %205 = arith.addf %198, %204 : vector<4x256xf32>
    %c4_101 = arith.constant 4 : index
    %c0_102 = arith.constant 0 : index
    %c0_103 = arith.constant 0 : index
    %206 = vector.load %arg5[%c4_101, %c0_102, %c0_103] : memref<9x4x4xf32, #tpu.memory_space<vmem>>, vector<1x4x4xf32>
    %207 = vector.shape_cast %206 : vector<1x4x4xf32> to vector<4x4xf32>
    %cst_104 = arith.constant dense<0.000000e+00> : vector<4x256xf32>
    %208 = tpu.matmul %207, %178, %cst_104 {dimension_numbers = #tpu.dot_dimension_numbers<[1], [0], [0], [1], [0, 0, 1, 1], [], []>} : vector<4x4xf32>, vector<4x256xf32>, vector<4x256xf32> -> vector<4x256xf32>
    %209 = arith.addf %205, %208 : vector<4x256xf32>
    %c5_105 = arith.constant 5 : index
    %c0_106 = arith.constant 0 : index
    %c0_107 = arith.constant 0 : index
    %210 = vector.load %arg5[%c5_105, %c0_106, %c0_107] : memref<9x4x4xf32, #tpu.memory_space<vmem>>, vector<1x4x4xf32>
    %211 = vector.shape_cast %210 : vector<1x4x4xf32> to vector<4x4xf32>
    %c254_i32 = arith.constant 254 : i32
    %212 = tpu.dynamic_rotate %178 by %c254_i32 dim 1 : vector<4x256xf32>, i32 -> vector<4x256xf32>
    %213 = vector.broadcast %50 : vector<1x256xf32> to vector<4x256xf32>
    %214 = arith.mulf %212, %213 : vector<4x256xf32>
    %cst_108 = arith.constant dense<0.000000e+00> : vector<4x256xf32>
    %215 = tpu.matmul %211, %214, %cst_108 {dimension_numbers = #tpu.dot_dimension_numbers<[1], [0], [0], [1], [0, 0, 1, 1], [], []>} : vector<4x4xf32>, vector<4x256xf32>, vector<4x256xf32> -> vector<4x256xf32>
    %216 = arith.addf %209, %215 : vector<4x256xf32>
    %c6_109 = arith.constant 6 : index
    %c0_110 = arith.constant 0 : index
    %c0_111 = arith.constant 0 : index
    %217 = vector.load %arg5[%c6_109, %c0_110, %c0_111] : memref<9x4x4xf32, #tpu.memory_space<vmem>>, vector<1x4x4xf32>
    %218 = vector.shape_cast %217 : vector<1x4x4xf32> to vector<4x4xf32>
    %c226_i32 = arith.constant 226 : i32
    %219 = tpu.dynamic_rotate %178 by %c226_i32 dim 1 : vector<4x256xf32>, i32 -> vector<4x256xf32>
    %220 = vector.broadcast %105 : vector<1x256xf32> to vector<4x256xf32>
    %221 = arith.mulf %219, %220 : vector<4x256xf32>
    %cst_112 = arith.constant dense<0.000000e+00> : vector<4x256xf32>
    %222 = tpu.matmul %218, %221, %cst_112 {dimension_numbers = #tpu.dot_dimension_numbers<[1], [0], [0], [1], [0, 0, 1, 1], [], []>} : vector<4x4xf32>, vector<4x256xf32>, vector<4x256xf32> -> vector<4x256xf32>
    %223 = arith.addf %216, %222 : vector<4x256xf32>
    %c7_113 = arith.constant 7 : index
    %c0_114 = arith.constant 0 : index
    %c0_115 = arith.constant 0 : index
    %224 = vector.load %arg5[%c7_113, %c0_114, %c0_115] : memref<9x4x4xf32, #tpu.memory_space<vmem>>, vector<1x4x4xf32>
    %225 = vector.shape_cast %224 : vector<1x4x4xf32> to vector<4x4xf32>
    %c224_i32 = arith.constant 224 : i32
    %226 = tpu.dynamic_rotate %178 by %c224_i32 dim 1 : vector<4x256xf32>, i32 -> vector<4x256xf32>
    %227 = vector.broadcast %98 : vector<1x256xf32> to vector<4x256xf32>
    %228 = arith.mulf %226, %227 : vector<4x256xf32>
    %cst_116 = arith.constant dense<0.000000e+00> : vector<4x256xf32>
    %229 = tpu.matmul %225, %228, %cst_116 {dimension_numbers = #tpu.dot_dimension_numbers<[1], [0], [0], [1], [0, 0, 1, 1], [], []>} : vector<4x4xf32>, vector<4x256xf32>, vector<4x256xf32> -> vector<4x256xf32>
    %230 = arith.addf %223, %229 : vector<4x256xf32>
    %c8_117 = arith.constant 8 : index
    %c0_118 = arith.constant 0 : index
    %c0_119 = arith.constant 0 : index
    %231 = vector.load %arg5[%c8_117, %c0_118, %c0_119] : memref<9x4x4xf32, #tpu.memory_space<vmem>>, vector<1x4x4xf32>
    %232 = vector.shape_cast %231 : vector<1x4x4xf32> to vector<4x4xf32>
    %c222_i32 = arith.constant 222 : i32
    %233 = tpu.dynamic_rotate %178 by %c222_i32 dim 1 : vector<4x256xf32>, i32 -> vector<4x256xf32>
    %234 = vector.broadcast %106 : vector<1x256xf32> to vector<4x256xf32>
    %235 = arith.mulf %233, %234 : vector<4x256xf32>
    %cst_120 = arith.constant dense<0.000000e+00> : vector<4x256xf32>
    %236 = tpu.matmul %232, %235, %cst_120 {dimension_numbers = #tpu.dot_dimension_numbers<[1], [0], [0], [1], [0, 0, 1, 1], [], []>} : vector<4x4xf32>, vector<4x256xf32>, vector<4x256xf32> -> vector<4x256xf32>
    %237 = arith.addf %230, %236 : vector<4x256xf32>
    %c0_121 = arith.constant 0 : index
    %c0_122 = arith.constant 0 : index
    %238 = vector.load %arg6[%c0_121, %c0_122] : memref<4x1xf32, #tpu.memory_space<vmem>>, vector<4x1xf32>
    %239 = vector.broadcast %238 : vector<4x1xf32> to vector<4x256xf32>
    %240 = arith.addf %237, %239 : vector<4x256xf32>
    %c0_123 = arith.constant 0 : index
    %c0_124 = arith.constant 0 : index
    %241 = vector.load %arg11[%c0_123, %c0_124] : memref<4x4xf32, #tpu.memory_space<vmem>>, vector<4x4xf32>
    %cst_125 = arith.constant dense<0.000000e+00> : vector<4x256xf32>
    %242 = tpu.matmul %241, %240, %cst_125 {dimension_numbers = #tpu.dot_dimension_numbers<[1], [0], [0], [1], [0, 0, 1, 1], [], []>} : vector<4x4xf32>, vector<4x256xf32>, vector<4x256xf32> -> vector<4x256xf32>
    %c0_126 = arith.constant 0 : index
    %c0_127 = arith.constant 0 : index
    %243 = vector.load %arg13[%c0_126, %c0_127] : memref<4x1xf32, #tpu.memory_space<vmem>>, vector<4x1xf32>
    %244 = vector.broadcast %243 : vector<4x1xf32> to vector<4x256xf32>
    %245 = arith.addf %242, %244 : vector<4x256xf32>
    %c0_128 = arith.constant 0 : index
    %c0_129 = arith.constant 0 : index
    %246 = vector.load %arg7[%c0_128, %c0_129] : memref<4x4xf32, #tpu.memory_space<vmem>>, vector<4x4xf32>
    %cst_130 = arith.constant dense<0.000000e+00> : vector<4x256xf32>
    %247 = tpu.matmul %246, %108, %cst_130 {dimension_numbers = #tpu.dot_dimension_numbers<[1], [0], [0], [1], [0, 0, 1, 1], [], []>} : vector<4x4xf32>, vector<4x256xf32>, vector<4x256xf32> -> vector<4x256xf32>
    %c0_131 = arith.constant 0 : index
    %c0_132 = arith.constant 0 : index
    %248 = vector.load %arg8[%c0_131, %c0_132] : memref<4x1xf32, #tpu.memory_space<vmem>>, vector<4x1xf32>
    %249 = vector.broadcast %248 : vector<4x1xf32> to vector<4x256xf32>
    %250 = arith.addf %247, %249 : vector<4x256xf32>
    %cst_133 = arith.constant 5.000000e-01 : f32
    %251 = vector.broadcast %cst_133 : f32 to vector<4x256xf32>
    %252 = arith.mulf %251, %250 : vector<4x256xf32>
    %cst_134 = arith.constant 0.707106769 : f32
    %253 = vector.broadcast %cst_134 : f32 to vector<4x256xf32>
    %254 = arith.mulf %250, %253 : vector<4x256xf32>
    %255 = math.erf %254 : vector<4x256xf32>
    %cst_135 = arith.constant 1.000000e+00 : f32
    %256 = vector.broadcast %cst_135 : f32 to vector<4x256xf32>
    %257 = arith.addf %256, %255 : vector<4x256xf32>
    %258 = arith.mulf %252, %257 : vector<4x256xf32>
    %c0_136 = arith.constant 0 : index
    %c0_137 = arith.constant 0 : index
    %c0_138 = arith.constant 0 : index
    %259 = vector.load %arg9[%c0_136, %c0_137, %c0_138] : memref<9x4x4xf32, #tpu.memory_space<vmem>>, vector<1x4x4xf32>
    %260 = vector.shape_cast %259 : vector<1x4x4xf32> to vector<4x4xf32>
    %c17_i32_139 = arith.constant 17 : i32
    %261 = tpu.dynamic_rotate %258 by %c17_i32_139 dim 1 : vector<4x256xf32>, i32 -> vector<4x256xf32>
    %262 = vector.broadcast %99 : vector<1x256xf32> to vector<4x256xf32>
    %263 = arith.mulf %261, %262 : vector<4x256xf32>
    %cst_140 = arith.constant dense<0.000000e+00> : vector<4x256xf32>
    %264 = tpu.matmul %260, %263, %cst_140 {dimension_numbers = #tpu.dot_dimension_numbers<[1], [0], [0], [1], [0, 0, 1, 1], [], []>} : vector<4x4xf32>, vector<4x256xf32>, vector<4x256xf32> -> vector<4x256xf32>
    %c1_141 = arith.constant 1 : index
    %c0_142 = arith.constant 0 : index
    %c0_143 = arith.constant 0 : index
    %265 = vector.load %arg9[%c1_141, %c0_142, %c0_143] : memref<9x4x4xf32, #tpu.memory_space<vmem>>, vector<1x4x4xf32>
    %266 = vector.shape_cast %265 : vector<1x4x4xf32> to vector<4x4xf32>
    %c16_i32_144 = arith.constant 16 : i32
    %267 = tpu.dynamic_rotate %258 by %c16_i32_144 dim 1 : vector<4x256xf32>, i32 -> vector<4x256xf32>
    %268 = vector.broadcast %74 : vector<1x256xf32> to vector<4x256xf32>
    %269 = arith.mulf %267, %268 : vector<4x256xf32>
    %cst_145 = arith.constant dense<0.000000e+00> : vector<4x256xf32>
    %270 = tpu.matmul %266, %269, %cst_145 {dimension_numbers = #tpu.dot_dimension_numbers<[1], [0], [0], [1], [0, 0, 1, 1], [], []>} : vector<4x4xf32>, vector<4x256xf32>, vector<4x256xf32> -> vector<4x256xf32>
    %271 = arith.addf %264, %270 : vector<4x256xf32>
    %c2_146 = arith.constant 2 : index
    %c0_147 = arith.constant 0 : index
    %c0_148 = arith.constant 0 : index
    %272 = vector.load %arg9[%c2_146, %c0_147, %c0_148] : memref<9x4x4xf32, #tpu.memory_space<vmem>>, vector<1x4x4xf32>
    %273 = vector.shape_cast %272 : vector<1x4x4xf32> to vector<4x4xf32>
    %c15_i32_149 = arith.constant 15 : i32
    %274 = tpu.dynamic_rotate %258 by %c15_i32_149 dim 1 : vector<4x256xf32>, i32 -> vector<4x256xf32>
    %275 = vector.broadcast %100 : vector<1x256xf32> to vector<4x256xf32>
    %276 = arith.mulf %274, %275 : vector<4x256xf32>
    %cst_150 = arith.constant dense<0.000000e+00> : vector<4x256xf32>
    %277 = tpu.matmul %273, %276, %cst_150 {dimension_numbers = #tpu.dot_dimension_numbers<[1], [0], [0], [1], [0, 0, 1, 1], [], []>} : vector<4x4xf32>, vector<4x256xf32>, vector<4x256xf32> -> vector<4x256xf32>
    %278 = arith.addf %271, %277 : vector<4x256xf32>
    %c3_151 = arith.constant 3 : index
    %c0_152 = arith.constant 0 : index
    %c0_153 = arith.constant 0 : index
    %279 = vector.load %arg9[%c3_151, %c0_152, %c0_153] : memref<9x4x4xf32, #tpu.memory_space<vmem>>, vector<1x4x4xf32>
    %280 = vector.shape_cast %279 : vector<1x4x4xf32> to vector<4x4xf32>
    %c1_i32_154 = arith.constant 1 : i32
    %281 = tpu.dynamic_rotate %258 by %c1_i32_154 dim 1 : vector<4x256xf32>, i32 -> vector<4x256xf32>
    %282 = vector.broadcast %26 : vector<1x256xf32> to vector<4x256xf32>
    %283 = arith.mulf %281, %282 : vector<4x256xf32>
    %cst_155 = arith.constant dense<0.000000e+00> : vector<4x256xf32>
    %284 = tpu.matmul %280, %283, %cst_155 {dimension_numbers = #tpu.dot_dimension_numbers<[1], [0], [0], [1], [0, 0, 1, 1], [], []>} : vector<4x4xf32>, vector<4x256xf32>, vector<4x256xf32> -> vector<4x256xf32>
    %285 = arith.addf %278, %284 : vector<4x256xf32>
    %c4_156 = arith.constant 4 : index
    %c0_157 = arith.constant 0 : index
    %c0_158 = arith.constant 0 : index
    %286 = vector.load %arg9[%c4_156, %c0_157, %c0_158] : memref<9x4x4xf32, #tpu.memory_space<vmem>>, vector<1x4x4xf32>
    %287 = vector.shape_cast %286 : vector<1x4x4xf32> to vector<4x4xf32>
    %cst_159 = arith.constant dense<0.000000e+00> : vector<4x256xf32>
    %288 = tpu.matmul %287, %258, %cst_159 {dimension_numbers = #tpu.dot_dimension_numbers<[1], [0], [0], [1], [0, 0, 1, 1], [], []>} : vector<4x4xf32>, vector<4x256xf32>, vector<4x256xf32> -> vector<4x256xf32>
    %289 = arith.addf %285, %288 : vector<4x256xf32>
    %c5_160 = arith.constant 5 : index
    %c0_161 = arith.constant 0 : index
    %c0_162 = arith.constant 0 : index
    %290 = vector.load %arg9[%c5_160, %c0_161, %c0_162] : memref<9x4x4xf32, #tpu.memory_space<vmem>>, vector<1x4x4xf32>
    %291 = vector.shape_cast %290 : vector<1x4x4xf32> to vector<4x4xf32>
    %c255_i32_163 = arith.constant 255 : i32
    %292 = tpu.dynamic_rotate %258 by %c255_i32_163 dim 1 : vector<4x256xf32>, i32 -> vector<4x256xf32>
    %293 = vector.broadcast %38 : vector<1x256xf32> to vector<4x256xf32>
    %294 = arith.mulf %292, %293 : vector<4x256xf32>
    %cst_164 = arith.constant dense<0.000000e+00> : vector<4x256xf32>
    %295 = tpu.matmul %291, %294, %cst_164 {dimension_numbers = #tpu.dot_dimension_numbers<[1], [0], [0], [1], [0, 0, 1, 1], [], []>} : vector<4x4xf32>, vector<4x256xf32>, vector<4x256xf32> -> vector<4x256xf32>
    %296 = arith.addf %289, %295 : vector<4x256xf32>
    %c6_165 = arith.constant 6 : index
    %c0_166 = arith.constant 0 : index
    %c0_167 = arith.constant 0 : index
    %297 = vector.load %arg9[%c6_165, %c0_166, %c0_167] : memref<9x4x4xf32, #tpu.memory_space<vmem>>, vector<1x4x4xf32>
    %298 = vector.shape_cast %297 : vector<1x4x4xf32> to vector<4x4xf32>
    %c241_i32_168 = arith.constant 241 : i32
    %299 = tpu.dynamic_rotate %258 by %c241_i32_168 dim 1 : vector<4x256xf32>, i32 -> vector<4x256xf32>
    %300 = vector.broadcast %101 : vector<1x256xf32> to vector<4x256xf32>
    %301 = arith.mulf %299, %300 : vector<4x256xf32>
    %cst_169 = arith.constant dense<0.000000e+00> : vector<4x256xf32>
    %302 = tpu.matmul %298, %301, %cst_169 {dimension_numbers = #tpu.dot_dimension_numbers<[1], [0], [0], [1], [0, 0, 1, 1], [], []>} : vector<4x4xf32>, vector<4x256xf32>, vector<4x256xf32> -> vector<4x256xf32>
    %303 = arith.addf %296, %302 : vector<4x256xf32>
    %c7_170 = arith.constant 7 : index
    %c0_171 = arith.constant 0 : index
    %c0_172 = arith.constant 0 : index
    %304 = vector.load %arg9[%c7_170, %c0_171, %c0_172] : memref<9x4x4xf32, #tpu.memory_space<vmem>>, vector<1x4x4xf32>
    %305 = vector.shape_cast %304 : vector<1x4x4xf32> to vector<4x4xf32>
    %c240_i32_173 = arith.constant 240 : i32
    %306 = tpu.dynamic_rotate %258 by %c240_i32_173 dim 1 : vector<4x256xf32>, i32 -> vector<4x256xf32>
    %307 = vector.broadcast %86 : vector<1x256xf32> to vector<4x256xf32>
    %308 = arith.mulf %306, %307 : vector<4x256xf32>
    %cst_174 = arith.constant dense<0.000000e+00> : vector<4x256xf32>
    %309 = tpu.matmul %305, %308, %cst_174 {dimension_numbers = #tpu.dot_dimension_numbers<[1], [0], [0], [1], [0, 0, 1, 1], [], []>} : vector<4x4xf32>, vector<4x256xf32>, vector<4x256xf32> -> vector<4x256xf32>
    %310 = arith.addf %303, %309 : vector<4x256xf32>
    %c8_175 = arith.constant 8 : index
    %c0_176 = arith.constant 0 : index
    %c0_177 = arith.constant 0 : index
    %311 = vector.load %arg9[%c8_175, %c0_176, %c0_177] : memref<9x4x4xf32, #tpu.memory_space<vmem>>, vector<1x4x4xf32>
    %312 = vector.shape_cast %311 : vector<1x4x4xf32> to vector<4x4xf32>
    %c239_i32_178 = arith.constant 239 : i32
    %313 = tpu.dynamic_rotate %258 by %c239_i32_178 dim 1 : vector<4x256xf32>, i32 -> vector<4x256xf32>
    %314 = vector.broadcast %102 : vector<1x256xf32> to vector<4x256xf32>
    %315 = arith.mulf %313, %314 : vector<4x256xf32>
    %cst_179 = arith.constant dense<0.000000e+00> : vector<4x256xf32>
    %316 = tpu.matmul %312, %315, %cst_179 {dimension_numbers = #tpu.dot_dimension_numbers<[1], [0], [0], [1], [0, 0, 1, 1], [], []>} : vector<4x4xf32>, vector<4x256xf32>, vector<4x256xf32> -> vector<4x256xf32>
    %317 = arith.addf %310, %316 : vector<4x256xf32>
    %c0_180 = arith.constant 0 : index
    %c0_181 = arith.constant 0 : index
    %318 = vector.load %arg10[%c0_180, %c0_181] : memref<4x1xf32, #tpu.memory_space<vmem>>, vector<4x1xf32>
    %319 = vector.broadcast %318 : vector<4x1xf32> to vector<4x256xf32>
    %320 = arith.addf %317, %319 : vector<4x256xf32>
    %c0_182 = arith.constant 0 : index
    %c0_183 = arith.constant 0 : index
    %321 = vector.load %arg12[%c0_182, %c0_183] : memref<4x4xf32, #tpu.memory_space<vmem>>, vector<4x4xf32>
    %cst_184 = arith.constant dense<0.000000e+00> : vector<4x256xf32>
    %322 = tpu.matmul %321, %320, %cst_184 {dimension_numbers = #tpu.dot_dimension_numbers<[1], [0], [0], [1], [0, 0, 1, 1], [], []>} : vector<4x4xf32>, vector<4x256xf32>, vector<4x256xf32> -> vector<4x256xf32>
    %323 = arith.addf %245, %322 : vector<4x256xf32>
    %324 = vector.broadcast %0 : f32 to vector<4x256xf32>
    %325 = arith.mulf %324, %323 : vector<4x256xf32>
    %326 = arith.addf %108, %325 : vector<4x256xf32>
    %c0_185 = arith.constant 0 : index
    %c0_186 = arith.constant 0 : index
    %c0_187 = arith.constant 0 : index
    %327 = vector.load %arg15[%c0_185, %c0_186, %c0_187] : memref<1x4x256xf32, #tpu.memory_space<vmem>>, vector<1x4x256xf32>
    %328 = vector.shape_cast %327 : vector<1x4x256xf32> to vector<4x256xf32>
    %329 = vector.shape_cast %326 : vector<4x256xf32> to vector<1x4x256xf32>
    tpu.vector_store %arg15[%c0_185, %c0_186, %c0_187], %329 {strides = array<i32>} : memref<1x4x256xf32, #tpu.memory_space<vmem>>, vector<1x4x256xf32>,
    return
  }
  func.func @transform_0(%arg0: i32) -> (i32, i32, i32) {
    %c0_i32 = arith.constant 0 : i32
    %c0_i32_0 = arith.constant 0 : i32
    %c0_i32_1 = arith.constant 0 : i32
    return %arg0, %c0_i32, %c0_i32_0 : i32, i32, i32
  }
  func.func @transform_1(%arg0: i32) -> (i32, i32) {
    %c0_i32 = arith.constant 0 : i32
    %c0_i32_0 = arith.constant 0 : i32
    %c0_i32_1 = arith.constant 0 : i32
    return %c0_i32, %c0_i32_0 : i32, i32
  }
  func.func @transform_2(%arg0: i32) -> (i32, i32, i32) {
    %c0_i32 = arith.constant 0 : i32
    %c0_i32_0 = arith.constant 0 : i32
    %c0_i32_1 = arith.constant 0 : i32
    %c0_i32_2 = arith.constant 0 : i32
    return %c0_i32, %c0_i32_0, %c0_i32_1 : i32, i32, i32
  }
  func.func @transform_3(%arg0: i32) -> (i32, i32) {
    %c0_i32 = arith.constant 0 : i32
    %c0_i32_0 = arith.constant 0 : i32
    %c0_i32_1 = arith.constant 0 : i32
    return %c0_i32, %c0_i32_0 : i32, i32
  }
  func.func @transform_4(%arg0: i32) -> (i32, i32, i32) {
    %c0_i32 = arith.constant 0 : i32
    %c0_i32_0 = arith.constant 0 : i32
    %c0_i32_1 = arith.constant 0 : i32
    %c0_i32_2 = arith.constant 0 : i32
    return %c0_i32, %c0_i32_0, %c0_i32_1 : i32, i32, i32
  }
  func.func @transform_5(%arg0: i32) -> (i32, i32) {
    %c0_i32 = arith.constant 0 : i32
    %c0_i32_0 = arith.constant 0 : i32
    %c0_i32_1 = arith.constant 0 : i32
    return %c0_i32, %c0_i32_0 : i32, i32
  }
  func.func @transform_6(%arg0: i32) -> (i32, i32) {
    %c0_i32 = arith.constant 0 : i32
    %c0_i32_0 = arith.constant 0 : i32
    %c0_i32_1 = arith.constant 0 : i32
    return %c0_i32, %c0_i32_0 : i32, i32
  }
  func.func @transform_7(%arg0: i32) -> (i32, i32) {
    %c0_i32 = arith.constant 0 : i32
    %c0_i32_0 = arith.constant 0 : i32
    %c0_i32_1 = arith.constant 0 : i32
    return %c0_i32, %c0_i32_0 : i32, i32
  }
  func.func @transform_8(%arg0: i32) -> (i32, i32, i32) {
    %c0_i32 = arith.constant 0 : i32
    %c0_i32_0 = arith.constant 0 : i32
    %c0_i32_1 = arith.constant 0 : i32
    %c0_i32_2 = arith.constant 0 : i32
    return %c0_i32, %c0_i32_0, %c0_i32_1 : i32, i32, i32
  }
  func.func @transform_9(%arg0: i32) -> (i32, i32) {
    %c0_i32 = arith.constant 0 : i32
    %c0_i32_0 = arith.constant 0 : i32
    %c0_i32_1 = arith.constant 0 : i32
    return %c0_i32, %c0_i32_0 : i32, i32
  }
  func.func @transform_10(%arg0: i32) -> (i32, i32) {
    %c0_i32 = arith.constant 0 : i32
    %c0_i32_0 = arith.constant 0 : i32
    %c0_i32_1 = arith.constant 0 : i32
    return %c0_i32, %c0_i32_0 : i32, i32
  }
  func.func @transform_11(%arg0: i32) -> (i32, i32) {
    %c0_i32 = arith.constant 0 : i32
    %c0_i32_0 = arith.constant 0 : i32
    %c0_i32_1 = arith.constant 0 : i32
    return %c0_i32, %c0_i32_0 : i32, i32
  }
  func.func @transform_12(%arg0: i32) -> (i32, i32) {
    %c0_i32 = arith.constant 0 : i32
    %c0_i32_0 = arith.constant 0 : i32
    %c0_i32_1 = arith.constant 0 : i32
    return %c0_i32, %c0_i32_0 : i32, i32
  }
  func.func @transform_13(%arg0: i32) -> (i32, i32) {
    %c0_i32 = arith.constant 0 : i32
    %c0_i32_0 = arith.constant 0 : i32
    %c0_i32_1 = arith.constant 0 : i32
    return %c0_i32, %c0_i32_0 : i32, i32
  }
  func.func @transform_14(%arg0: i32) -> (i32, i32, i32) {
    %c0_i32 = arith.constant 0 : i32
    %c0_i32_0 = arith.constant 0 : i32
    %c0_i32_1 = arith.constant 0 : i32
    return %arg0, %c0_i32, %c0_i32_0 : i32, i32, i32
  }
}

</mosaic_0001>

<bundles_post_ra>
// kernel: tpu_custom_call.1
= control target key start
LH: loop header
LB: loop body
LE: loop exit
PB: predicated region body
PF: predicated region fallthrough
CT: control target
= control target key end

     0   :  { %s4630_s0 = inlined_call_operand.vmem [shape: f32[2,4,256], index: 0, kind: input, shape index: {}]   ;;  %s4631_s1 = inlined_call_operand.vmem [shape: s32[2,256], index: 1, kind: input, shape index: {}]   ;;  %s4632_s2 = inlined_call_operand.vmem [shape: f32[9,4,4], index: 2, kind: input, shape index: {}]   ;;  %s4633_s3 = inlined_call_operand.vmem [shape: f32[4,1], index: 3, kind: input, shape index: {}]   ;;  %s4634_s4 = inlined_call_operand.vmem [shape: f32[9,4,4], index: 4, kind: input, shape index: {}]   ;;  %s4635_s5 = inlined_call_operand.vmem [shape: f32[4,1], index: 5, kind: input, shape index: {}]   ;;  %s4636_s6 = inlined_call_operand.vmem [shape: f32[4,4], index: 6, kind: input, shape index: {}]   ;;  %s4637_s7 = inlined_call_operand.vmem [shape: f32[4,1], index: 7, kind: input, shape index: {}]   ;;  %s4638_s8 = inlined_call_operand.vmem [shape: f32[9,4,4], index: 8, kind: input, shape index: {}]   ;;  %s4639_s9 = inlined_call_operand.vmem [shape: f32[4,1], index: 9, kind: input, shape index: {}]   ;;  %s4640_s10 = inlined_call_operand.vmem [shape: f32[4,4], index: 10, kind: input, shape index: {}]   ;;  %s4641_s11 = inlined_call_operand.vmem [shape: f32[4,4], index: 11, kind: input, shape index: {}]   ;;  %s4642_s12 = inlined_call_operand.vmem [shape: f32[4,1], index: 12, kind: input, shape index: {}]   ;;  %s4643_s13 = inlined_call_operand.<no memory space> [shape: f32[1,1], index: 13, kind: input, shape index: {}]   ;;  %s4644_s14 = inlined_call_operand.hbm [shape: f32[2,4,256], index: 14, kind: output, shape index: {}]  }
   0x1   :  { %4665 = sst [smem:[#allocation6_spill]] %s4630_s0 }
   0x2   :  { %4666 = sst [smem:[#allocation7_spill]] %s4631_s1 }
   0x3   :  { %4667 = sst [smem:[#allocation8_spill]] %s4632_s2 }
   0x4   :  { %19 = sst [smem:[#allocation2]] %s4643_s13 }
   0x5   :  { %20 = vsyncpa [#allocation4], 0 }
   0x6   :  { %22 = vsyncpa [#allocation4 + $0x1], 0  ;;  %s3951_s15 = smov 0   ;;  %s3953_s16 = smov 0  }
   0x7   :  { %s3955_s17 = smov 0   ;;  %s3957_s18 = smov 0  }
   0x8 LB: > { %s3972_s13 = sadd.s32 4294967295, %s3852_s18   ;;  %s3540_s19 = sadd.s32 4294967294, %s3852_s18   ;;  %s3852_s18 = sphi %s3957_s18, %s4692_s18   ;;  %s3848_s17 = sphi %s3955_s17, %s4691_s17   ;;  %s3844_s16 = sphi %s3953_s16, %s4690_s16   ;;  %s3840_s15 = sphi %s3951_s15, %s4689_s15  }
   0x9   : > { %s3976_s20 = sadd.s32 1, %s3852_s18   ;;  %s334_s21 = sadd.s32 1, %s3848_s17 }
   0xa   : > { %s331_s22 = ssub.s32 %s3852_s18, %s3976_s20  ;;  %p344_p0 = scmp.ne.s32.totalorder %s3848_s17, %s3844_s16 }
   0xb   : > { %p332_p1 = scmp.eq.s32.totalorder %s331_s22, 0  ;;  %p345_p2 = scmp.eq.s32.totalorder %s3972_s13, 1 }
   0xc   : > { %p350_p3 = scmp.ne.s32.totalorder %s3844_s16, %s3840_s15  ;;  %p351_p4 = scmp.eq.s32.totalorder %s3540_s19, 1 }
   0xd   : > { %s3987_s23 = scalar_select %p332_p1, %s3848_s17, %s334_s21  }
   0xe   : > { %p3989_p5 = por %p345_p2, %p344_p0  ;;  %p3993_p6 = por %p351_p4, %p350_p3 }
   0xf   : > { %p3543_p7 = scmp.ge.s32.totalorder %s3852_s18, 1  ;;  %p416_p8 = scmp.lt.s32.totalorder %s3852_s18, 3 }
  0x11   : > { %p417_p9 = pnand %p3543_p7, %p416_p8 }
  0x12   : > { %p462_p10 = scmp.lt.s32.totalorder (!%p417_p9), %s3972_s13, 1  ;;  %v3854_v0 = vmov (!%p417_p9), 0.0   ;;  %s4670_s0 = sld [smem:[#allocation6_spill]] (!%p417_p9)  ;;  %v3863_v3 = vmov (!%p417_p9), 0   ;;  %v1436_v4 = vld [vmem:[%s4633_s3] sm:$0xf] (!%p417_p9)  ;;  %v528_v9 = vlaneseq (!%p417_p9) }
  0x13   : > { %420 = sbr.rel (%p417_p9) target bundleno = 1480 (0x5c8), region = 76  ;;  %643 = vmatprep.mubr.f32.mxu1 (!%p417_p9), %v3854_v0  ;;  %1115 = vmatprep.mubr.f32.mxu0 (!%p417_p9), %v3854_v0  ;;  %s4653_s19 = smov (!%p417_p9), 17   ;;  %vm572_vm13 = vcmask (!%p417_p9), 1043456  }
  0x14   : > { %s4657_s21 = smov (!%p417_p9), 16   ;;  %s4645_s22 = smov (!%p417_p9), 127   ;;  %3778 = vset.pattern.permute.xlu0 (!%p417_p9), %v3863_v3  ;;  %3779 = vset.pattern.permute.xlu1 (!%p417_p9), %v3863_v3  ;;  %v535_v11 = vshrl.u32 (!%p417_p9), %v528_v9, 7  ;;  %v4068_v15 = vand.u32 (!%p417_p9), 127, %v528_v9 }
  0x15   : > { %s4651_s28 = smov (!%p417_p9), 1   ;;  %s4655_s29 = smov (!%p417_p9), 112  }
  0x16   : > { %s4671_s1 = sld [smem:[#allocation7_spill]] (!%p417_p9)  ;;  %v4070_v16 = vsub.s32 (!%p417_p9), 0, %v535_v11  ;;  %v4072_v17 = vsub.s32 (!%p417_p9), 1, %v535_v11  ;;  %vm530_vm11 = vcmp.lt.s32.totalorder (!%p417_p9), %v4068_v15, 17  ;;  %vm552_vm12 = vcmp.lt.s32.totalorder (!%p417_p9), %v4068_v15, 16  ;;  %s4672_s2 = sld [smem:[#allocation8_spill]] (!%p417_p9) }
  0x17   : > { %vm4664_vm14 = vcmp.lt.s32.totalorder (!%p417_p9), %v4068_v15, 127 }
  0x1a   : > { %s463_s26 = scalar_select %p462_p10, %s3972_s13, 1 }
  0x1c   : > { %s3667_s27 = sshll.u32 %s463_s26, 3  ;;  %s4649_s26 = smov 15   ;;  %v4053_v5 = vld [vmem:[%s4671_s1] ss:$2 sm:$0x3] }
  0x1d   : > { %s4006_s30 = scalar_lea.vmem %s4670_s0, %s3667_s27  ;;  %s4647_s27 = smov 113   ;;  %v4058_v6 = vld [vmem:[%s4671_s1 + $0x1] ss:$2 sm:$0x3]  ;;  %v476_v7 = vadd.s32 4294967295, %v4053_v5  ;;  %v481_v10 = vadd.s32 1, %v4053_v5 }
  0x1e   : > { %v4009_v1 = vld [vmem:[%s4006_s30] sm:$0xff]  ;;  %v496_v8 = vadd.s32 4294967295, %v4058_v6  ;;  %v501_v14 = vadd.s32 1, %v4058_v6  ;;  %v3567_v50 = vld [vmem:[%s4672_s2 + $0x14] sm:$0xf]  ;;  %s4675_s0 = smov 15  }
  0x1f   : > { %524 = vrot.lane.b32.xlu1 %v4009_v1, %s4653_s19  ;;  %548 = vrot.lane.b32.xlu0 %v4009_v1, %s4657_s21  ;;  %v4017_v2 = vcombine.high %v4009_v1, %v4009_v1  ;;  %vm477_vm0 = vcmp.ge.s32.totalorder %v476_v7, 0  ;;  %vm478_vm1 = vcmp.lt.s32.totalorder %v476_v7, 16  ;;  %vm482_vm6 = vcmp.ge.s32.totalorder %v481_v10, 0  ;;  %v3548_v37 = vld [vmem:[%s4672_s2 + $0x4] sm:$0xf] }
  0x20   : > { %vm497_vm2 = vcmp.ge.s32.totalorder %v496_v8, 0  ;;  %vm498_vm3 = vcmp.lt.s32.totalorder %v496_v8, 16  ;;  %vm479_vm4 = vmand %vm477_vm0, %vm478_vm1  ;;  %vm483_vm7 = vcmp.lt.s32.totalorder %v481_v10, 16  ;;  %vm502_vm9 = vcmp.ge.s32.totalorder %v501_v14, 0  ;;  %v520_v59 = vld [vmem:[%s4672_s2] sm:$0xf] }
  0x21   : > { %vm499_vm5 = vmand %vm497_vm2, %vm498_vm3  ;;  %v4064_v12 = vsel %vm479_vm4, 1.0, %v3854_v0  ;;  %vm503_vm10 = vcmp.lt.s32.totalorder %v501_v14, 16  ;;  %vm568_vm0 = vcmask 31744   ;;  %vm736_vm1 = vcmp.lt.s32.totalorder %v4068_v15, 15  ;;  %v3571_v9 = vld [vmem:[%s4672_s2 + $0x18] sm:$0xf] }
  0x22   : > { %v500_v13 = vsel %vm499_vm5, 1.0, %v3854_v0  ;;  %vm484_vm8 = vmand %vm482_vm6, %vm483_vm7  ;;  %vm4663_vm2 = vcmp.lt.s32.totalorder %v4068_v15, 113  ;;  %vm840_vm3 = vcmp.lt.s32.totalorder %v4068_v15, 1  ;;  %v4172_v7 = vrot.slane %v4064_v12, %v4072_v17 }
  0x23   : > { %526 = vrot.lane.b32.xlu1 %v4017_v2, %s4653_s19  ;;  %550 = vrot.lane.b32.xlu0 %v4017_v2, %s4657_s21  ;;  %v511_v20 = vmul.f32 %v500_v13, %v4064_v12  ;;  %v4076_v21 = vsel %vm484_vm8, 1.0, %v3854_v0  ;;  %v4081_v22 = vrot.slane %v500_v13, %v4070_v16  ;;  %v4084_v23 = vrot.slane %v500_v13, %v4072_v17  ;;  %vm504_vm15 = vmand %vm502_vm9, %vm503_vm10  ;;  %s3864_s19 = smov 34   ;;  %s3865_s21 = smov 32  }
  0x24   : > { %v4095_v28 = vrot.slane %v4076_v21, %v4070_v16  ;;  %v512_v32 = vmul.f32 %v500_v13, %v4076_v21  ;;  %v4110_v36 = vrot.slane %v4076_v21, %v4072_v17  ;;  %v505_v38 = vsel %vm504_vm15, 1.0, %v3854_v0 }
  0x25   : > { %v4087_v24 = vrot.slane %v511_v20, %v4070_v16  ;;  %v4090_v25 = vrot.slane %v511_v20, %v4072_v17  ;;  %v513_v48 = vmul.f32 %v505_v38, %v4064_v12  ;;  %v4177_v8 = vrot.slane %v4064_v12, %v4070_v16 }
  0x26   : > { %v4125_v45 = vrot.slane %v512_v32, %v4072_v17  ;;  %v4135_v49 = vrot.slane %v512_v32, %v4070_v16  ;;  %vm4662_vm4 = vcmp.lt.s32.totalorder %v4068_v15, 112  ;;  %v514_v20 = vmul.f32 %v505_v38, %v4076_v21 }
  0x27   : > { %1024 = vrot.lane.b32.xlu1 %v4017_v2, %s4645_s22  ;;  %1022 = vrot.lane.b32.xlu0 %v4009_v1, %s4645_s22  ;;  %s4659_s22 = smov 111   ;;  %v4151_v56 = vrot.slane %v513_v48, %v4070_v16  ;;  %v4154_v57 = vrot.slane %v513_v48, %v4072_v17  ;;  %vm4661_vm5 = vcmp.lt.s32.totalorder %v4068_v15, 111 }
  0x2b   : > { %734 = vrot.lane.b32.xlu1 %v4017_v2, %s4649_s26  ;;  %732 = vrot.lane.b32.xlu0 %v4009_v1, %s4649_s26  ;;  %s3866_s26 = smov 30  }
  0x2f   : > { %1128 = vrot.lane.b32.xlu1 %v4017_v2, %s4647_s27  ;;  %1126 = vrot.lane.b32.xlu0 %v4009_v1, %s4647_s27  ;;  %s3867_s27 = smov 2  }
  0x33   : > { %838 = vrot.lane.b32.xlu1 %v4017_v2, %s4651_s28  ;;  %836 = vrot.lane.b32.xlu0 %v4009_v1, %s4651_s28  ;;  %s3868_s28 = smov 126  }
  0x37   : > { %1232 = vrot.lane.b32.xlu1 %v4017_v2, %s4655_s29  ;;  %1230 = vrot.lane.b32.xlu0 %v4009_v1, %s4655_s29  ;;  %s3869_s29 = smov 98  }
  0x3b   : > { %1336 = vrot.lane.b32.xlu1 %v4017_v2, %s4659_s22  ;;  %1334 = vrot.lane.b32.xlu0 %v4009_v1, %s4659_s22  ;;  %s3870_s22 = smov 96  }
  0x3f   : > { %1439 = vperm.xlu0 %3778, %v1436_v4  }
  0x91   : > { %v525_v18 = vpop.permute.xlu1 %524  ;;  %v549_v19 = vpop.permute.xlu0 %548 }
  0x95   : > { %v527_v26 = vpop.permute.xlu1 %526  ;;  %v551_v27 = vpop.permute.xlu0 %550 }
  0x96   : > { %v531_v29 = vsel %vm530_vm11, %v525_v18, %v527_v26  ;;  %v553_v30 = vsel %vm552_vm12, %v549_v19, %v551_v27  ;;  %v554_v31 = vsel %vm552_vm12, %v551_v27, %v549_v19  ;;  %v532_v33 = vsel %vm530_vm11, %v527_v26, %v525_v18  ;;  %v3555_v27 = vld [vmem:[%s4672_s2 + $0x8] sm:$0xf] }
  0x97   : > { %v566_v34 = vmul.f32 %v4081_v22, %v554_v31  ;;  %v567_v35 = vmul.f32 %v4084_v23, %v553_v30  ;;  %v545_v39 = vmul.f32 %v4090_v25, %v531_v29  ;;  %v544_v42 = vmul.f32 %v4087_v24, %v532_v33 }
  0x98   : > { %v4193_v18 = vrot.slane %v505_v38, %v4070_v16  ;;  %v4196_v19 = vrot.slane %v505_v38, %v4072_v17 }
  0x99   : > { %v1025_v40 = vpop.permute.xlu1 %1024  ;;  %3549 = vmatprep.subr.msk.mxu1 %vm572_vm13, %v567_v35  ;;  %v1023_v41 = vpop.permute.xlu0 %1022  ;;  %v4217_v35 = vrot.slane %v514_v20, %v4072_v17 }
  0x9a   : > { %v1027_v43 = vsel %vm4664_vm14, %v1023_v41, %v1025_v40  ;;  %v1028_v44 = vsel %vm4664_vm14, %v1025_v40, %v1023_v41  ;;  %3550 = vmatpush1.msk.msra.mxu1 %vm572_vm13, %v566_v34  ;;  %v4214_v34 = vrot.slane %v514_v20, %v4070_v16  ;;  %v471_v20 = vadd.s32 4294967294, %v4053_v5 }
  0x9b   : > { %v1040_v46 = vmul.f32 %v4095_v28, %v1027_v43  ;;  %3551 = vmatmul.mubr.msk.f32.vlgmr.msra.gmra.mrb[0].mxu1 %vm568_vm0, %v3548_v37  ;;  %3552 = vmatprep.subr.msk.mxu1 %vm572_vm13, %v545_v39  ;;  %v1041_v47 = vmul.f32 %v4110_v36, %v1028_v44  ;;  %v3575_v37 = vld [vmem:[%s4672_s2 + $0x1c] sm:$0xf]  ;;  %v3559_v44 = vld [vmem:[%s4672_s2 + $0xc] sm:$0xf]  ;;  %vm1481_vm14 = vcmp.lt.s32.totalorder %v4068_v15, 32 }
  0x9c   : > { %3553 = vmatpush1.msk.msra.mxu1 %vm572_vm13, %v544_v42  ;;  %723 = vmatprep.mubr.f32.mxu1 %v3854_v0  ;;  %vm472_vm6 = vcmp.ge.s32.totalorder %v471_v20, 0  ;;  %vm473_vm7 = vcmp.lt.s32.totalorder %v471_v20, 16 }
  0x9d   : > { %v735_v51 = vpop.permute.xlu1 %734  ;;  %3568 = vmatprep.subr.msk.mxu0 %vm572_vm13, %v1041_v47  ;;  %v733_v52 = vpop.permute.xlu0 %732  ;;  %v3563_v47 = vld [vmem:[%s4672_s2 + $0x10] sm:$0xf]  ;;  %vm474_vm10 = vmand %vm472_vm6, %vm473_vm7  ;;  %vm1459_vm6 = vcmp.lt.s32.totalorder %v4068_v15, 34  ;;  %vm1955_vm7 = vcmp.lt.s32.totalorder %v4068_v15, 126 }
  0x9e   : > { %v737_v53 = vsel %vm736_vm1, %v733_v52, %v735_v51  ;;  %v738_v54 = vsel %vm736_vm1, %v735_v51, %v733_v52  ;;  %3569 = vmatpush1.msk.msra.mxu0 %vm572_vm13, %v1040_v46  ;;  %v3579_v46 = vld [vmem:[%s4672_s2 + $0x20] sm:$0xf] }
  0x9f   : > { %v751_v55 = vmul.f32 %v4125_v45, %v737_v53  ;;  %3570 = vmatmul.mubr.msk.f32.vlgmr.msra.gmra.mrb[0].mxu0 %vm568_vm0, %v3567_v50  ;;  %v750_v58 = vmul.f32 %v4135_v49, %v738_v54 }
  0xa0   : > { %1219 = vmatprep.mubr.f32.mxu0 %v3854_v0 }
  0xa1   : > { %v1129_v60 = vpop.permute.xlu1 %1128  ;;  %3556 = vmatprep.subr.msk.mxu1 %vm572_vm13, %v751_v55  ;;  %v1127_v61 = vpop.permute.xlu0 %1126 }
  0xa2   : > { %v1131_v62 = vsel %vm4663_vm2, %v1127_v61, %v1129_v60  ;;  %v1132_v63 = vsel %vm4663_vm2, %v1129_v60, %v1127_v61 }
  0xa3   : > { %v1144_v3 = vmul.f32 %v4151_v56, %v1131_v62  ;;  %v1145_v4 = vmul.f32 %v4154_v57, %v1132_v63  ;;  %3554 = vmatmul.mubr.msk.f32.vlgmr.msra.gmra.mrb[0].mxu1 %vm568_vm0, %v520_v59 }
  0xa4   : > { %3557 = vmatpush1.msk.msra.mxu1 %vm572_vm13, %v750_v58  ;;  %825 = vmatprep.mubr.f32.mxu1 %v3854_v0 }
  0xa5   : > { %v839_v10 = vpop.permute.xlu1 %838  ;;  %3572 = vmatprep.subr.msk.mxu0 %vm572_vm13, %v1145_v4  ;;  %v837_v11 = vpop.permute.xlu0 %836 }
  0xa6   : > { %v841_v13 = vsel %vm840_vm3, %v837_v11, %v839_v10  ;;  %v842_v14 = vsel %vm840_vm3, %v839_v10, %v837_v11  ;;  %3573 = vmatpush1.msk.msra.mxu0 %vm572_vm13, %v1144_v3 }
  0xa7   : > { %v855_v12 = vmul.f32 %v4172_v7, %v841_v13  ;;  %3574 = vmatmul.mubr.msk.f32.vlgmr.msra.gmra.mrb[0].mxu0 %vm568_vm0, %v3571_v9  ;;  %v854_v26 = vmul.f32 %v4177_v8, %v842_v14  ;;  %v2461_v14 = vld [vmem:[%s4637_s7] sm:$0xf] }
  0xa8   : > { %1323 = vmatprep.mubr.f32.mxu0 %v3854_v0 }
  0xa9   : > { %v1233_v29 = vpop.permute.xlu1 %1232  ;;  %3560 = vmatprep.subr.msk.mxu1 %vm572_vm13, %v855_v12  ;;  %v1231_v30 = vpop.permute.xlu0 %1230  ;;  %v2365_v12 = vld [vmem:[%s4635_s5] sm:$0xf] }
  0xaa   : > { %v1235_v31 = vsel %vm4662_vm4, %v1231_v30, %v1233_v29  ;;  %v1236_v32 = vsel %vm4662_vm4, %v1233_v29, %v1231_v30  ;;  %v4285_v29 = vsel %vm474_vm10, 1.0, %v3854_v0  ;;  %vm2163_vm10 = vcmp.lt.s32.totalorder %v4068_v15, 96 }
  0xab   : > { %v1248_v21 = vmul.f32 %v4193_v18, %v1235_v31  ;;  %v1249_v33 = vmul.f32 %v4196_v19, %v1236_v32  ;;  %3558 = vmatmul.mubr.msk.f32.vlgmr.msra.gmra.mrb[0].mxu1 %vm568_vm0, %v3555_v27  ;;  %v486_v27 = vadd.s32 2, %v4053_v5  ;;  %v1774_v20 = vrot.slane %v4285_v29, %v4070_v16 }
  0xac   : > { %3561 = vmatpush1.msk.msra.mxu1 %vm572_vm13, %v854_v26  ;;  %929 = vmatprep.mubr.f32.mxu1 %v3854_v0  ;;  %v491_v26 = vadd.s32 4294967294, %v4058_v6 }
  0xad   : > { %3576 = vmatprep.subr.msk.mxu0 %vm572_vm13, %v1249_v33  ;;  %v1337_v38 = vpop.permute.xlu1 %1336  ;;  %v1335_v39 = vpop.permute.xlu0 %1334  ;;  %3564 = vmatprep.subr.msk.mxu1 %vm572_vm13, %v4017_v2  ;;  %vm488_vm4 = vcmp.lt.s32.totalorder %v486_v27, 16 }
  0xae   : > { %3577 = vmatpush1.msk.msra.mxu0 %vm572_vm13, %v1248_v21  ;;  %v1339_v40 = vsel %vm4661_vm5, %v1335_v39, %v1337_v38  ;;  %v1340_v41 = vsel %vm4661_vm5, %v1337_v38, %v1335_v39  ;;  %vm492_vm8 = vcmp.ge.s32.totalorder %v491_v26, 0  ;;  %vm493_vm9 = vcmp.lt.s32.totalorder %v491_v26, 16 }
  0xaf   : > { %3578 = vmatmul.mubr.msk.f32.vlgmr.msra.gmra.mrb[0].mxu0 %vm568_vm0, %v3575_v37  ;;  %v1352_v42 = vmul.f32 %v4214_v34, %v1339_v40  ;;  %v1353_v43 = vmul.f32 %v4217_v35, %v1340_v41  ;;  %vm494_vm15 = vmand %vm492_vm8, %vm493_vm9  ;;  %vm487_vm5 = vcmp.ge.s32.totalorder %v486_v27, 0  ;;  %v506_v26 = vadd.s32 2, %v4058_v6 }
  0xb0   : > { %1427 = vmatprep.mubr.f32.mxu0 %v3854_v0  ;;  %v495_v30 = vsel %vm494_vm15, 1.0, %v3854_v0  ;;  %vm489_vm2 = vmand %vm487_vm5, %vm488_vm4  ;;  %vm2059_vm9 = vcmp.lt.s32.totalorder %v4068_v15, 98  ;;  %vm2267_vm15 = vcmp.lt.s32.totalorder %v4068_v15, 94 }
  0xb1   : > { %3580 = vmatprep.subr.msk.mxu0 %vm572_vm13, %v1353_v43  ;;  %v515_v32 = vmul.f32 %v495_v30, %v4285_v29  ;;  %v1488_v21 = vrot.slane %v495_v30, %v4070_v16  ;;  %v1492_v33 = vrot.slane %v495_v30, %v4072_v17  ;;  %v4293_v5 = vsel %vm489_vm2, 1.0, %v3854_v0 }
  0xb2   : > { %3581 = vmatpush1.msk.msra.mxu0 %vm572_vm13, %v1352_v42  ;;  %vm1767_vm2 = vcmp.lt.s32.totalorder %v4068_v15, 2  ;;  %vm507_vm4 = vcmp.ge.s32.totalorder %v506_v26, 0  ;;  %vm508_vm5 = vcmp.lt.s32.totalorder %v506_v26, 16 }
  0xb3   : > { %3562 = vmatmul.mubr.msk.f32.vlgmr.msra.gmra.mrb[0].mxu1 %vm568_vm0, %v3559_v44  ;;  %v1466_v41 = vrot.slane %v515_v32, %v4070_v16  ;;  %v1470_v44 = vrot.slane %v515_v32, %v4072_v17  ;;  %vm509_vm8 = vmand %vm507_vm4, %vm508_vm5 }
  0xb4   : > { %3565 = vmatpush1.msk.msra.mxu1 %vm572_vm13, %v4009_v1  ;;  %1011 = vmatprep.mubr.f32.mxu1 %v3854_v0 }
  0xb7   : > { %3582 = vmatmul.mubr.msk.f32.vlgmr.msra.gmra.mrb[0].mxu0 %vm568_vm0, %v3579_v46  ;;  %v516_v46 = vmul.f32 %v495_v30, %v4293_v5  ;;  %v3590_v30 = vld [vmem:[%s4634_s4 + $0x8] sm:$0xf] }
  0xb8   : > { %2453 = vmatprep.mubr.f32.mxu0 %v3854_v0 }
  0xbb   : > { %3566 = vmatmul.mubr.msk.f32.vlgmr.msra.gmra.mrb[0].mxu1 %vm568_vm0, %v3563_v47  ;;  %v3583_v47 = vld [vmem:[%s4634_s4 + $0x4] sm:$0xf] }
  0xbc   : > { %1570 = vmatprep.mubr.f32.mxu1 %v3854_v0 }
  0xbe   : > { %v1440_v52 = vpop.permute.xlu0 %1439 }
 0x18a   : > { %v1429_v48 = vpop.f32.mrb[0].mxu0 }
 0x18b   : > { %v1431_v50 = vpop.f32.mrb[1].mxu0 }
 0x18e   : > { %v1013_v51 = vpop.f32.mrb[0].mxu1 }
 0x18f   : > { %v3669_v53 = vadd.f32 %v1429_v48, %v1013_v51  ;;  %v1015_v54 = vpop.f32.mrb[1].mxu1 }
 0x190   : > { %v3670_v55 = vadd.f32 %v1431_v50, %v1015_v54 }
 0x191   : > { %v1442_v58 = vadd.f32 %v3669_v53, %v1440_v52 }
 0x192   : > { %v1443_v59 = vadd.f32 %v3670_v55, %v1440_v52  ;;  %v1674_v55 = vrot.slane %v516_v46, %v4072_v17 }
 0x193   : > { %v1446_v60 = vmul.f32 0.70710677, %v1442_v58  ;;  %v1444_v3 = vmul.f32 0.5, %v1442_v58 }
 0x194   : > { %v1447_v61 = vmul.f32 0.70710677, %v1443_v59  ;;  %v1445_v11 = vmul.f32 0.5, %v1443_v59  ;;  %v1670_v59 = vrot.slane %v516_v46, %v4070_v16 }
 0x195   : > { %3781 = verf.f32 %v1446_v60 }
 0x196   : > { %3783 = verf.f32 %v1447_v61 }
 0x19f   : > { %v3782_v62 = vpop.eup %3781 }
 0x1a0   : > { %v3784_v63 = vpop.eup %3783  ;;  %v1450_v4 = vadd.f32 1.0, %v3782_v62 }
 0x1a1   : > { %v1451_v9 = vadd.f32 1.0, %v3784_v63  ;;  %v1778_v63 = vrot.slane %v4285_v29, %v4072_v17 }
 0x1a2   : > { %v4255_v10 = vmul.f32 %v1450_v4, %v1444_v3  ;;  %v1454_v3 = vld [vmem:[%s4634_s4] sm:$0xf] }
 0x1a3   : > { %v4259_v13 = vmul.f32 %v1451_v9, %v1445_v11 }
 0x1a4   : > { %1455 = vrot.lane.b32.xlu0 %v4255_v10, %s3864_s19  ;;  %1477 = vrot.lane.b32.xlu1 %v4255_v10, %s3865_s21 }
 0x1a8   : > { %1659 = vrot.lane.b32.xlu0 %v4255_v10, %s3866_s26  ;;  %1479 = vrot.lane.b32.xlu1 %v4259_v13, %s3865_s21  ;;  %s3871_s21 = smov 94  }
 0x1ac   : > { %1763 = vrot.lane.b32.xlu0 %v4255_v10, %s3867_s27  ;;  %1457 = vrot.lane.b32.xlu1 %v4259_v13, %s3864_s19  ;;  %s4680_s19 = smov 111  }
 0x1b0   : > { %1951 = vrot.lane.b32.xlu0 %v4255_v10, %s3868_s28  ;;  %1661 = vrot.lane.b32.xlu1 %v4259_v13, %s3866_s26  ;;  %s4673_s26 = smov 16  }
 0x1b4   : > { %2055 = vrot.lane.b32.xlu0 %v4255_v10, %s3869_s29  ;;  %1765 = vrot.lane.b32.xlu1 %v4259_v13, %s3867_s27  ;;  %s4674_s27 = smov 17  }
 0x1b8   : > { %2159 = vrot.lane.b32.xlu0 %v4255_v10, %s3870_s22  ;;  %1953 = vrot.lane.b32.xlu1 %v4259_v13, %s3868_s28  ;;  %s4677_s28 = smov 127  }
 0x1bc   : > { %2263 = vrot.lane.b32.xlu0 %v4255_v10, %s3871_s21  ;;  %2057 = vrot.lane.b32.xlu1 %v4259_v13, %s3869_s29  ;;  %s4678_s29 = smov 113  }
 0x1c0   : > { %2464 = vperm.xlu0 %3778, %v2461_v14   ;;  %2161 = vrot.lane.b32.xlu1 %v4259_v13, %s3870_s22  ;;  %s4676_s22 = smov 1  }
 0x1c4   : > { %2265 = vrot.lane.b32.xlu1 %v4259_v13, %s3871_s21  ;;  %s4679_s21 = smov 112  }
 0x1c8   : > { %2368 = vperm.xlu1 %3779, %v2365_v12  }
 0x216   : > { %v1478_v31 = vpop.permute.xlu1 %1477  ;;  %v1456_v37 = vpop.permute.xlu0 %1455 }
 0x21a   : > { %v1480_v38 = vpop.permute.xlu1 %1479  ;;  %v1660_v52 = vpop.permute.xlu0 %1659 }
 0x21b   : > { %v1482_v39 = vsel %vm1481_vm14, %v1478_v31, %v1480_v38  ;;  %v1483_v40 = vsel %vm1481_vm14, %v1480_v38, %v1478_v31  ;;  %vm1663_vm14 = vcmp.lt.s32.totalorder %v4068_v15, 30  ;;  %v3594_v38 = vld [vmem:[%s4634_s4 + $0xc] sm:$0xf] }
 0x21c   : > { %v1495_v42 = vmul.f32 %v1488_v21, %v1483_v40  ;;  %v1496_v43 = vmul.f32 %v1492_v33, %v1482_v39  ;;  %v1966_v21 = vrot.slane %v4293_v5, %v4072_v17 }
 0x21e   : > { %3584 = vmatprep.subr.msk.mxu1 %vm572_vm13, %v1496_v43  ;;  %v1458_v48 = vpop.permute.xlu1 %1457  ;;  %v1764_v4 = vpop.permute.xlu0 %1763 }
 0x21f   : > { %v1460_v50 = vsel %vm1459_vm6, %v1456_v37, %v1458_v48  ;;  %v1461_v51 = vsel %vm1459_vm6, %v1458_v48, %v1456_v37  ;;  %3585 = vmatpush1.msk.msra.mxu1 %vm572_vm13, %v1495_v42  ;;  %v510_v37 = vsel %vm509_vm8, 1.0, %v3854_v0  ;;  %vm4685_vm6 = vcmp.lt.s32.totalorder %v4068_v15, 112 }
 0x220   : > { %v1473_v53 = vmul.f32 %v1466_v41, %v1461_v51  ;;  %v1474_v54 = vmul.f32 %v1470_v44, %v1460_v50  ;;  %3586 = vmatmul.mubr.msk.f32.vlgmr.msra.gmra.mrb[2].mxu1 %vm568_vm0, %v3583_v47  ;;  %v517_v40 = vmul.f32 %v510_v37, %v4285_v29  ;;  %v1962_v41 = vrot.slane %v4293_v5, %v4070_v16 }
 0x221   : > { %1650 = vmatprep.mubr.f32.mxu1 %v3854_v0 }
 0x222   : > { %3587 = vmatprep.subr.msk.mxu1 %vm572_vm13, %v1474_v54  ;;  %v1662_v58 = vpop.permute.xlu1 %1661  ;;  %v1952_v6 = vpop.permute.xlu0 %1951  ;;  %v2070_v29 = vrot.slane %v517_v40, %v4072_v17  ;;  %v2066_v50 = vrot.slane %v517_v40, %v4070_v16 }
 0x223   : > { %v1664_v60 = vsel %vm1663_vm14, %v1660_v52, %v1662_v58  ;;  %3588 = vmatpush1.msk.msra.mxu1 %vm572_vm13, %v1473_v53  ;;  %v1665_v61 = vsel %vm1663_vm14, %v1662_v58, %v1660_v52  ;;  %v2174_v53 = vrot.slane %v510_v37, %v4072_v17  ;;  %vm4686_vm14 = vmmov %vm4685_vm6 }
 0x224   : > { %v1678_v62 = vmul.f32 %v1674_v55, %v1664_v60  ;;  %v1677_v11 = vmul.f32 %v1670_v59, %v1665_v61  ;;  %v3602_v55 = vld [vmem:[%s4634_s4 + $0x14] sm:$0xf]  ;;  %v518_v60 = vmul.f32 %v510_v37, %v4293_v5 }
 0x226   : > { %3591 = vmatprep.subr.msk.mxu1 %vm572_vm13, %v1678_v62  ;;  %v1766_v9 = vpop.permute.xlu1 %1765  ;;  %v2056_v42 = vpop.permute.xlu0 %2055  ;;  %v2170_v62 = vrot.slane %v510_v37, %v4070_v16 }
 0x227   : > { %v1768_v14 = vsel %vm1767_vm2, %v1764_v4, %v1766_v9  ;;  %v1769_v27 = vsel %vm1767_vm2, %v1766_v9, %v1764_v4  ;;  %v2278_v4 = vrot.slane %v518_v60, %v4072_v17  ;;  %v3606_v9 = vld [vmem:[%s4634_s4 + $0x18] sm:$0xf]  ;;  %vm4687_vm2 = vcmp.lt.s32.totalorder %v4068_v15, 111 }
 0x228   : > { %v1782_v12 = vmul.f32 %v1778_v63, %v1768_v14  ;;  %3589 = vmatmul.mubr.msk.f32.vlgmr.msra.gmra.mrb[2].mxu1 %vm568_vm0, %v1454_v3  ;;  %v1781_v31 = vmul.f32 %v1774_v20, %v1769_v27  ;;  %v3610_v20 = vld [vmem:[%s4634_s4 + $0x1c] sm:$0xf]  ;;  %v2460_v27 = vld [vmem:[%s4636_s6] sm:$0xf]  ;;  %vm4688_vm4 = vmmov %vm4687_vm2 }
 0x229   : > { %3592 = vmatpush1.msk.msra.mxu1 %vm572_vm13, %v1677_v11  ;;  %1752 = vmatprep.mubr.f32.mxu1 %v3854_v0 }
 0x22a   : > { %3595 = vmatprep.subr.msk.mxu1 %vm572_vm13, %v1782_v12  ;;  %v1954_v32 = vpop.permute.xlu1 %1953  ;;  %v2160_v51 = vpop.permute.xlu0 %2159  ;;  %v2274_v12 = vrot.slane %v518_v60, %v4070_v16  ;;  %v3614_v16 = vld [vmem:[%s4634_s4 + $0x20] sm:$0xf]  ;;  %v3624_v60 = vld [vmem:[%s4638_s8 + $0x4] sm:$0xf] }
 0x22b   : > { %v1957_v33 = vsel %vm1955_vm7, %v1954_v32, %v1952_v6  ;;  %v1956_v43 = vsel %vm1955_vm7, %v1952_v6, %v1954_v32 }
 0x22c   : > { %v1970_v39 = vmul.f32 %v1966_v21, %v1957_v33  ;;  %v1969_v46 = vmul.f32 %v1962_v41, %v1956_v43 }
 0x22e   : > { %v2264_v63 = vpop.permute.xlu0 %2263 }
 0x230   : > { %3593 = vmatmul.mubr.msk.f32.vlgmr.msra.gmra.mrb[2].mxu1 %vm568_vm0, %v3590_v30 }
 0x231   : > { %3596 = vmatpush1.msk.msra.mxu1 %vm572_vm13, %v1781_v31  ;;  %1856 = vmatprep.mubr.f32.mxu1 %v3854_v0 }
 0x232   : > { %3599 = vmatprep.subr.msk.mxu1 %vm572_vm13, %v4259_v13  ;;  %v2058_v13 = vpop.permute.xlu1 %2057 }
 0x233   : > { %v2061_v44 = vsel %vm2059_vm9, %v2058_v13, %v2056_v42  ;;  %v2060_v52 = vsel %vm2059_vm9, %v2056_v42, %v2058_v13  ;;  %v2373_v13 = vld [vmem:[%s4640_s10] sm:$0xf] }
 0x234   : > { %v2074_v47 = vmul.f32 %v2070_v29, %v2061_v44  ;;  %v2073_v58 = vmul.f32 %v2066_v50, %v2060_v52  ;;  %v2374_v50 = vld [vmem:[%s4642_s12] sm:$0xf] }
 0x236   : > { %v2162_v48 = vpop.permute.xlu1 %2161 }
 0x237   : > { %v2165_v54 = vsel %vm2163_vm10, %v2162_v48, %v2160_v51  ;;  %v2164_v3 = vsel %vm2163_vm10, %v2160_v51, %v2162_v48  ;;  %v3366_v48 = vld [vmem:[%s4639_s9] sm:$0xf] }
 0x238   : > { %3597 = vmatmul.mubr.msk.f32.vlgmr.msra.gmra.mrb[2].mxu1 %vm568_vm0, %v3594_v38  ;;  %v2178_v59 = vmul.f32 %v2174_v53, %v2165_v54  ;;  %v2177_v11 = vmul.f32 %v2170_v62, %v2164_v3 }
 0x239   : > { %3600 = vmatpush1.msk.msra.mxu1 %vm572_vm13, %v4255_v10  ;;  %1940 = vmatprep.mubr.f32.mxu1 %v3854_v0  ;;  %v3598_v10 = vld [vmem:[%s4634_s4 + $0x10] sm:$0xf] }
 0x23a   : > { %3603 = vmatprep.subr.msk.mxu1 %vm572_vm13, %v1970_v39  ;;  %v2266_v61 = vpop.permute.xlu1 %2265 }
 0x23b   : > { %v2269_v5 = vsel %vm2267_vm15, %v2266_v61, %v2264_v63  ;;  %v2268_v17 = vsel %vm2267_vm15, %v2264_v63, %v2266_v61 }
 0x23c   : > { %v2282_v14 = vmul.f32 %v2278_v4, %v2269_v5  ;;  %v2281_v26 = vmul.f32 %v2274_v12, %v2268_v17 }
 0x23f   : > { %v2465_v21 = vpop.permute.xlu0 %2464 }
 0x240   : > { %3601 = vmatmul.mubr.msk.f32.vlgmr.msra.gmra.mrb[2].mxu1 %vm568_vm0, %v3598_v10 }
 0x241   : > { %3604 = vmatpush1.msk.msra.mxu1 %vm572_vm13, %v1969_v46  ;;  %2044 = vmatprep.mubr.f32.mxu1 %v3854_v0 }
 0x242   : > { %3607 = vmatprep.subr.msk.mxu1 %vm572_vm13, %v2074_v47 }
 0x247   : > { %v2369_v30 = vpop.permute.xlu1 %2368 }
 0x248   : > { %3605 = vmatmul.mubr.msk.f32.vlgmr.msra.gmra.mrb[2].mxu1 %vm568_vm0, %v3602_v55 }
 0x249   : > { %3608 = vmatpush1.msk.msra.mxu1 %vm572_vm13, %v2073_v58  ;;  %2148 = vmatprep.mubr.f32.mxu1 %v3854_v0 }
 0x24a   : > { %3611 = vmatprep.subr.msk.mxu1 %vm572_vm13, %v2178_v59 }
 0x250   : > { %3609 = vmatmul.mubr.msk.f32.vlgmr.msra.gmra.mrb[2].mxu1 %vm568_vm0, %v3606_v9 }
 0x251   : > { %3612 = vmatpush1.msk.msra.mxu1 %vm572_vm13, %v2177_v11  ;;  %2252 = vmatprep.mubr.f32.mxu1 %v3854_v0 }
 0x252   : > { %3615 = vmatprep.subr.msk.mxu1 %vm572_vm13, %v2282_v14 }
 0x258   : > { %3613 = vmatmul.mubr.msk.f32.vlgmr.msra.gmra.mrb[2].mxu1 %vm568_vm0, %v3610_v20 }
 0x259   : > { %3616 = vmatpush1.msk.msra.mxu1 %vm572_vm13, %v2281_v26  ;;  %2356 = vmatprep.mubr.f32.mxu1 %v3854_v0 }
 0x25a   : > { %3621 = vmatprep.subr.msk.mxu1 %vm572_vm13, %v4017_v2 }
 0x260   : > { %3617 = vmatmul.mubr.msk.f32.vlgmr.msra.gmra.mrb[2].mxu1 %vm568_vm0, %v3614_v16 }
 0x261   : > { %3622 = vmatpush1.msk.msra.mxu1 %vm572_vm13, %v4009_v1  ;;  %2534 = vmatprep.mubr.f32.mxu1 %v3854_v0 }
 0x264   : > { %3623 = vmatmul.mubr.msk.f32.vlgmr.msra.gmra.mrb[4].mxu1 %vm568_vm0, %v2460_v27 }
 0x333   : > { %v2358_v31 = vpop.f32.mrb[2].mxu1 }
 0x334   : > { %v2360_v2 = vpop.f32.mrb[3].mxu1  ;;  %v2371_v6 = vadd.f32 %v2369_v30, %v2358_v31 }
 0x335   : > { %v2372_v32 = vadd.f32 %v2369_v30, %v2360_v2  ;;  %v3635_v30 = vld [vmem:[%s4638_s8 + $0xc] sm:$0xf] }
 0x337   : > { %3618 = vmatprep.subr.msk.mxu0 %vm572_vm13, %v2372_v32  ;;  %v2536_v33 = vpop.f32.mrb[4].mxu1 }
 0x338   : > { %v2537_v37 = vadd.f32 %v2536_v33, %v2465_v21  ;;  %3619 = vmatpush1.msk.msra.mxu0 %vm572_vm13, %v2371_v6  ;;  %v2538_v1 = vpop.f32.mrb[5].mxu1 }
 0x339   : > { %v2539_v38 = vadd.f32 %v2538_v1, %v2465_v21  ;;  %3620 = vmatmul.mubr.msk.f32.vlgmr.msra.gmra.mrb[2].mxu0 %vm568_vm0, %v2373_v13 }
 0x33a   : > { %v2543_v39 = vmul.f32 0.70710677, %v2537_v37  ;;  %2643 = vmatprep.mubr.f32.mxu0 %v3854_v0  ;;  %v2541_v43 = vmul.f32 0.5, %v2537_v37 }
 0x33b   : > { %v2544_v40 = vmul.f32 0.70710677, %v2539_v38  ;;  %v2542_v44 = vmul.f32 0.5, %v2539_v38 }
 0x33c   : > { %3785 = verf.f32 %v2543_v39 }
 0x33d   : > { %3787 = verf.f32 %v2544_v40 }
 0x346   : > { %v3786_v41 = vpop.eup %3785 }
 0x347   : > { %v3788_v42 = vpop.eup %3787  ;;  %v2547_v29 = vadd.f32 1.0, %v3786_v41 }
 0x348   : > { %v2548_v10 = vadd.f32 1.0, %v3788_v42 }
 0x349   : > { %v4421_v46 = vmul.f32 %v2547_v29, %v2541_v43 }
 0x34a   : > { %v4423_v47 = vmul.f32 %v2548_v10, %v2542_v44  ;;  %v3651_v10 = vld [vmem:[%s4638_s8 + $0x1c] sm:$0xf] }
 0x34b   : > { %2562 = vrot.lane.b32.xlu0 %v4421_v46, %s4673_s26 }
 0x34c   : > { %2564 = vrot.lane.b32.xlu1 %v4423_v47, %s4673_s26  ;;  %s467_s26 = sld [smem:[#allocation2]] }
 0x34f   : > { %2552 = vrot.lane.b32.xlu0 %v4421_v46, %s4674_s27 }
 0x350   : > { %2554 = vrot.lane.b32.xlu1 %v4423_v47, %s4674_s27  ;;  %s459_s27 = sand.u32 1, %s3844_s16  }
 0x353   : > { %2732 = vrot.lane.b32.xlu0 %v4421_v46, %s4675_s0 }
 0x354   : > { %2734 = vrot.lane.b32.xlu1 %v4423_v47, %s4675_s0  ;;  %s3544_s0 = sshll.u32 %s459_s27, 3 }
 0x357   : > { %2824 = vrot.lane.b32.xlu0 %v4421_v46, %s4676_s22 }
 0x358   : > { %2826 = vrot.lane.b32.xlu1 %v4423_v47, %s4676_s22  ;;  %s3668_s22 = sshll.u32 %s3972_s13, 7  ;;  %s3872_s13 = smov [#allocation3]  }
 0x359   : > { %s4588_s1 = scalar_lea.hbm %s4644_s14, %s3668_s22 }
 0x35b   : > { %3000 = vrot.lane.b32.xlu0 %v4421_v46, %s4677_s28 }
 0x35c   : > { %3002 = vrot.lane.b32.xlu1 %v4423_v47, %s4677_s28  ;;  %s461_s28 = scalar_lea.vmem [#allocation3], %s3544_s0 }
 0x35f   : > { %3092 = vrot.lane.b32.xlu0 %v4421_v46, %s4678_s29 }
 0x360   : > { %3094 = vrot.lane.b32.xlu1 %v4423_v47, %s4678_s29  ;;  %s3481_s29 = sshll.u32 %s461_s28, 4  ;;  %s4590_s29 = int_to_ptr.vmem [resolvable:$true] %s3481_s29 }
 0x361   : > { %s3790_s2 = scalar_lea.vmem %s4590_s29, 128 }
 0x362   : > { %p3791_p11 = scmp.ne.s32.totalorder %s4590_s29, %s3790_s2 }
 0x363   : > { %3184 = vrot.lane.b32.xlu0 %v4421_v46, %s4679_s21 }
 0x364   : > { %3186 = vrot.lane.b32.xlu1 %v4423_v47, %s4679_s21  ;;  %p3792_p12 = pnand %p3791_p11, %p3989_p5 }
 0x366   : > { %p3793_p13 = pneg %p3792_p12 }
 0x367   : > { %3276 = vrot.lane.b32.xlu0 %v4421_v46, %s4680_s19 }
 0x368   : > { %3278 = vrot.lane.b32.xlu1 %v4423_v47, %s4680_s19 }
 0x36b   : > { %3369 = vperm.xlu0 %3778, %v3366_v48  }
 0x36c   : > { %2377 = vperm.xlu1 %3779, %v2374_v50   ;;  %v3374_v50 = vld [vmem:[%s4641_s11] sm:$0xf] }
 0x3bd   : > { %v2563_v51 = vpop.permute.xlu0 %2562 }
 0x3be   : > { %v2565_v52 = vpop.permute.xlu1 %2564 }
 0x3bf   : > { %v2566_v53 = vsel %vm552_vm12, %v2563_v51, %v2565_v52  ;;  %v2567_v54 = vsel %vm552_vm12, %v2565_v52, %v2563_v51  ;;  %v3457_v52 = vstv %s467_s26  ;;  %s3467_s26 = scalar_lea.sflag [#allocation4], %s459_s27 }
 0x3c0   : > { %v2568_v55 = vmul.f32 %v2567_v54, %v4081_v22  ;;  %v2569_v58 = vmul.f32 %v2566_v53, %v4084_v23 }
 0x3c1   : > { %v2553_v59 = vpop.permute.xlu0 %2552 }
 0x3c2   : > { %3625 = vmatprep.subr.msk.mxu0 %vm572_vm13, %v2569_v58  ;;  %v2555_v61 = vpop.permute.xlu1 %2554 }
 0x3c3   : > { %v2556_v62 = vsel %vm530_vm11, %v2553_v59, %v2555_v61  ;;  %v2557_v63 = vsel %vm530_vm11, %v2555_v61, %v2553_v59  ;;  %3626 = vmatpush1.msk.msra.mxu0 %vm572_vm13, %v2568_v55  ;;  %vm4681_vm11 = vcmp.lt.s32.totalorder %v4068_v15, 127  ;;  %v3789_v61 = vld [vmem:[%s4006_s30] sm:$0xff]  ;;  %s3794_s30 = sshll.u32 %s3872_s13, 4  ;;  %s3795_s30 = int_to_ptr.vmem [resolvable:$false] %s3794_s30 }
 0x3c4   : > { %v2558_v22 = vmul.f32 %v2557_v63, %v4087_v24  ;;  %v2559_v23 = vmul.f32 %v2556_v62, %v4090_v25  ;;  %3627 = vmatmul.mubr.msk.f32.vlgmr.msra.gmra.mrb[4].mxu0 %vm568_vm0, %v3624_v60  ;;  %v2551_v25 = vld [vmem:[%s4638_s8] sm:$0xf]  ;;  %vm4682_vm12 = vmmov %vm4681_vm11  ;;  %s3796_s0 = scalar_lea.vmem %s3795_s30, 256  ;;  %p3797_p0 = scmp.lt.s32.totalorder %s4590_s29, %s3795_s30 }
 0x3c5   : > { %v2733_v3 = vpop.permute.xlu0 %2732  ;;  %2723 = vmatprep.mubr.f32.mxu0 %v3854_v0  ;;  %p3798_p1 = scmp.lt.s32.totalorder %s3796_s0, %s3790_s2 }
 0x3c6   : > { %3628 = vmatprep.subr.msk.mxu0 %vm572_vm13, %v2559_v23  ;;  %v2735_v4 = vpop.permute.xlu1 %2734 }
 0x3c7   : > { %v2736_v5 = vsel %vm736_vm1, %v2733_v3, %v2735_v4  ;;  %3629 = vmatpush1.msk.msra.mxu0 %vm572_vm13, %v2558_v22  ;;  %v2737_v9 = vsel %vm736_vm1, %v2735_v4, %v2733_v3  ;;  %vm4683_vm1 = vcmp.lt.s32.totalorder %v4068_v15, 113  ;;  %p3799_p2 = por %p3798_p1, %p3797_p0 }
 0x3c8   : > { %v2739_v24 = vmul.f32 %v2736_v5, %v4125_v45  ;;  %v2738_v12 = vmul.f32 %v2737_v9, %v4135_v49  ;;  %v3631_v49 = vld [vmem:[%s4638_s8 + $0x8] sm:$0xf] }
 0x3c9   : > { %v2825_v11 = vpop.permute.xlu0 %2824  ;;  %p3800_p3 = pnand %p3799_p2, %p3793_p13 }
 0x3ca   : > { %3632 = vmatprep.subr.msk.mxu0 %vm572_vm13, %v2739_v24  ;;  %v2827_v14 = vpop.permute.xlu1 %2826 }
 0x3cb   : > { %v2828_v17 = vsel %vm840_vm3, %v2825_v11, %v2827_v14  ;;  %v2829_v45 = vsel %vm840_vm3, %v2827_v14, %v2825_v11  ;;  %vm4684_vm3 = vmmov %vm4683_vm1 }
 0x3cc   : > { %v2831_v20 = vmul.f32 %v2828_v17, %v4172_v7  ;;  %3630 = vmatmul.mubr.msk.f32.vlgmr.msra.gmra.mrb[4].mxu0 %vm568_vm0, %v2551_v25  ;;  %v2830_v26 = vmul.f32 %v2829_v45, %v4177_v8 }
 0x3cd   : > { %3633 = vmatpush1.msk.msra.mxu0 %vm572_vm13, %v2738_v12  ;;  %2813 = vmatprep.mubr.f32.mxu0 %v3854_v0  ;;  %v3001_v7 = vpop.permute.xlu0 %3000 }
 0x3ce   : > { %3636 = vmatprep.subr.msk.mxu0 %vm572_vm13, %v2831_v20  ;;  %v3003_v16 = vpop.permute.xlu1 %3002 }
 0x3cf   : > { %v3005_v27 = vsel %vm4681_vm11, %v3003_v16, %v3001_v7  ;;  %v3004_v32 = vsel %vm4682_vm12, %v3001_v7, %v3003_v16 }
 0x3d0   : > { %v3007_v8 = vmul.f32 %v3005_v27, %v4110_v36  ;;  %v3639_v36 = vld [vmem:[%s4638_s8 + $0x10] sm:$0xf]  ;;  %v3006_v21 = vmul.f32 %v3004_v32, %v4095_v28  ;;  %v3643_v28 = vld [vmem:[%s4638_s8 + $0x14] sm:$0xf] }
 0x3d1   : > { %v3093_v31 = vpop.permute.xlu0 %3092 }
 0x3d2   : > { %v3095_v2 = vpop.permute.xlu1 %3094 }
 0x3d3   : > { %v3097_v6 = vsel %vm4683_vm1, %v3095_v2, %v3093_v31  ;;  %v3096_v38 = vsel %vm4684_vm3, %v3093_v31, %v3095_v2 }
 0x3d4   : > { %3634 = vmatmul.mubr.msk.f32.vlgmr.msra.gmra.mrb[4].mxu0 %vm568_vm0, %v3631_v49  ;;  %v3099_v33 = vmul.f32 %v3097_v6, %v4154_v57  ;;  %v3098_v57 = vmul.f32 %v3096_v38, %v4151_v56  ;;  %v3647_v56 = vld [vmem:[%s4638_s8 + $0x18] sm:$0xf] }
 0x3d5   : > { %3637 = vmatpush1.msk.msra.mxu0 %vm572_vm13, %v2830_v26  ;;  %2905 = vmatprep.mubr.f32.mxu0 %v3854_v0  ;;  %v3185_v37 = vpop.permute.xlu0 %3184 }
 0x3d6   : > { %3640 = vmatprep.subr.msk.mxu0 %vm572_vm13, %v4423_v47  ;;  %v3187_v1 = vpop.permute.xlu1 %3186 }
 0x3d7   : > { %v3189_v39 = vsel %vm4685_vm6, %v3187_v1, %v3185_v37  ;;  %v3188_v42 = vsel %vm4686_vm14, %v3185_v37, %v3187_v1 }
 0x3d8   : > { %v3191_v40 = vmul.f32 %v3189_v39, %v4196_v19  ;;  %v3190_v19 = vmul.f32 %v3188_v42, %v4193_v18  ;;  %v3655_v18 = vld [vmem:[%s4638_s8 + $0x20] sm:$0xf] }
 0x3d9   : > { %v3277_v13 = vpop.permute.xlu0 %3276 }
 0x3da   : > { %v3279_v41 = vpop.permute.xlu1 %3278 }
 0x3db   : > { %v3281_v43 = vsel %vm4687_vm2, %v3279_v41, %v3277_v13  ;;  %v3280_v44 = vsel %vm4688_vm4, %v3277_v13, %v3279_v41 }
 0x3dc   : > { %3638 = vmatmul.mubr.msk.f32.vlgmr.msra.gmra.mrb[4].mxu0 %vm568_vm0, %v3635_v30  ;;  %v3283_v29 = vmul.f32 %v3281_v43, %v4217_v35 }
 0x3dd   : > { %3641 = vmatpush1.msk.msra.mxu0 %vm572_vm13, %v4421_v46  ;;  %2989 = vmatprep.mubr.f32.mxu0 %v3854_v0  ;;  %v3282_v46 = vmul.f32 %v3280_v44, %v4214_v34 }
 0x3de   : > { %3644 = vmatprep.subr.msk.mxu0 %vm572_vm13, %v3007_v8 }
 0x3e4   : > { %3642 = vmatmul.mubr.msk.f32.vlgmr.msra.gmra.mrb[4].mxu0 %vm568_vm0, %v3639_v36 }
 0x3e5   : > { %3645 = vmatpush1.msk.msra.mxu0 %vm572_vm13, %v3006_v21  ;;  %3081 = vmatprep.mubr.f32.mxu0 %v3854_v0 }
 0x3e6   : > { %3648 = vmatprep.subr.msk.mxu0 %vm572_vm13, %v3099_v33 }
 0x3ea   : > { %v3370_v35 = vpop.permute.xlu0 %3369 }
 0x3ec   : > { %3646 = vmatmul.mubr.msk.f32.vlgmr.msra.gmra.mrb[4].mxu0 %vm568_vm0, %v3643_v28 }
 0x3ed   : > { %3649 = vmatpush1.msk.msra.mxu0 %vm572_vm13, %v3098_v57  ;;  %3173 = vmatprep.mubr.f32.mxu0 %v3854_v0 }
 0x3ee   : > { %3652 = vmatprep.subr.msk.mxu0 %vm572_vm13, %v3191_v40 }
 0x3f4   : > { %3650 = vmatmul.mubr.msk.f32.vlgmr.msra.gmra.mrb[4].mxu0 %vm568_vm0, %v3647_v56 }
 0x3f5   : > { %3653 = vmatpush1.msk.msra.mxu0 %vm572_vm13, %v3190_v19  ;;  %3265 = vmatprep.mubr.f32.mxu0 %v3854_v0 }
 0x3f6   : > { %3656 = vmatprep.subr.msk.mxu0 %vm572_vm13, %v3283_v29 }
 0x3fc   : > { %3654 = vmatmul.mubr.msk.f32.vlgmr.msra.gmra.mrb[4].mxu0 %vm568_vm0, %v3651_v10 }
 0x3fd   : > { %3657 = vmatpush1.msk.msra.mxu0 %vm572_vm13, %v3282_v46  ;;  %3357 = vmatprep.mubr.f32.mxu0 %v3854_v0 }
 0x404   : > { %3658 = vmatmul.mubr.msk.f32.vlgmr.msra.gmra.mrb[4].mxu0 %vm568_vm0, %v3655_v18 }
 0x405   : > { %3448 = vmatprep.mubr.f32.mxu0 %v3854_v0  ;;  %v2378_v0 = vpop.permute.xlu1 %2377 }
 0x4d7   : > { %v3359_v15 = vpop.f32.mrb[4].mxu0 }
 0x4d8   : > { %v3361_v47 = vpop.f32.mrb[5].mxu0  ;;  %v3372_v34 = vadd.f32 %v3370_v35, %v3359_v15 }
 0x4d9   : > { %v3373_v48 = vadd.f32 %v3370_v35, %v3361_v47 }
 0x4db   : > { %3659 = vmatprep.subr.msk.mxu0 %vm572_vm13, %v3373_v48 }
 0x4dc   : > { %3660 = vmatpush1.msk.msra.mxu0 %vm572_vm13, %v3372_v34 }
 0x4dd   : > { %3661 = vmatmul.mubr.msk.f32.vlgmr.msra.gmra.mrb[2].mxu0 %vm568_vm0, %v3374_v50 }
 0x5b0   : > { %v3450_v51 = vpop.f32.mrb[2].mxu0 }
 0x5b1   : > { %v3671_v53 = vadd.f32 %v3450_v51, %v2378_v0  ;;  %v3452_v54 = vpop.f32.mrb[3].mxu0 }
 0x5b2   : > { %v3672_v55 = vadd.f32 %v3452_v54, %v2378_v0 }
 0x5b3   : > { %v3458_v58 = vmul.f32 %v3671_v53, %v3457_v52 }
 0x5b4   : > { %v3459_v59 = vmul.f32 %v3672_v55, %v3457_v52 }
 0x5b6   : > { %v3462_v60 = vcombine.low %v3458_v58, %v3459_v59 }
 0x5b8   : > { %v3464_v62 = vadd.f32 %v3789_v61, %v3462_v60 }
 0x5ba   : > { %3465 = vst [vmem:[%s461_s28] sm:$0xff] %v3464_v62 }
 0x5bb   : > { %3803 = shalt.err (!%p3800_p3)
}
 0x5bc   : > { %s3804_s27 = scalar_lea.hbm %s4588_s1, 128  ;;  %s3808_s21 = scalar_lea.hbm %s4644_s14, 256 }
 0x5bd   : > { %p3805_p4 = scmp.ne.s32.totalorder %s4588_s1, %s3804_s27  ;;  %p3809_p9 = scmp.lt.u32.totalorder %s4588_s1, %s4644_s14 }
 0x5be   : > { %p3810_p10 = scmp.lt.u32.totalorder %s3808_s21, %s3804_s27  ;;  %p3812_p12 = scmp.lt.u32.totalorder %s3804_s27, %s4588_s1 }
 0x5bf   : > { %p3806_p7 = pnand %p3805_p4, %p3989_p5 }
 0x5c0   : > { %p3811_p11 = por %p3810_p10, %p3809_p9 }
 0x5c1   : > { %p3807_p8 = pneg %p3806_p7 }
 0x5c2   : > { %p3813_p13 = por %p3812_p12, %p3811_p11 }
 0x5c4   : > { %p3814_p0 = pnand %p3813_p13, %p3807_p8 }
 0x5c6   : > { %3817 = shalt.err (!%p3814_p0)
}
 0x5c7   : > { %3721 = dma.vmem_to_hbm [thread:$0]  (%p3989_p5), %s4590_s29, 128, %s4588_s1, %s3467_s26  }
 0x5c8 PF: > { %p3727_p1 = scmp.ge.s32.totalorder %s3852_s18, 2  ;;  %s3493_s2 = sand.u32 1, %s3840_s15  }
 0x5c9   : > { %s3494_s30 = scalar_lea.sflag [#allocation4], %s3493_s2 }
 0x5ca   : > { %p3724_p2 = pnand %p3727_p1, %p3993_p6 }
 0x5cc   : > { %3835 = dma.done.wait (!%p3724_p2), %s3494_s30, 128  }
 0x5cd   : > { %3837 = vsyncadd (!%p3724_p2), %s3494_s30, 4294967168  ;;  %p25_p3 = scmp.ge.s32.totalorder %s3976_s20, 4   ;;  %s4689_s15 = smov %s3844_s16 }
 0x5ce   : > { %s4690_s16 = smov %s3848_s17  ;;  %s4691_s17 = smov %s3987_s23 }
 0x5cf   : > { %s4692_s18 = smov %s3976_s20  ;;  %27 = sbr.rel (!%p25_p3) target bundleno = 8 (0x8), region = 136 }
 0x5d6   :  { %3499 = vsyncpa [#allocation4], 1 }
 0x5d7   :  { %3501 = vsyncpa [#allocation4 + $0x1], 1 }

</bundles_post_ra>
